<compile_context>
chip_gen: v7x
topology: tpu7x:2x2x1
jax: 0.10.0
libtpu: 0.0.40
codegen_flags: <defaults>
</compile_context>

<pallas_src>
import functools
import math

import jax
import jax.numpy as jnp
from jax import lax
from jax.experimental import pallas as pl
from jax.experimental.pallas import tpu as pltpu


# ---------------------------------------------------------------------------
# 1) Fused row-wise L2 normalization of both views + diagonal sim[i,i]/tau.
#    Outputs: n1_scaled = (h1_i / ||h1_i||) / tau  (bf16)   <- 1/tau folded here
#             n2        =  h2_i / ||h2_i||          (bf16)
#             diag      = <n1_i, n2_i> / tau        (f32, computed from f32 values)
# ---------------------------------------------------------------------------
def _norm_diag_kernel(h1_ref, h2_ref, n1_ref, n2_ref, diag_ref, *, inv_tau):
    x1 = h1_ref[...].astype(jnp.float32)
    x2 = h2_ref[...].astype(jnp.float32)
    # x / max(||x||, 1e-12) == x * rsqrt(max(||x||^2, 1e-24)); rsqrt goes to the EUP.
    u1 = x1 * lax.rsqrt(jnp.maximum(jnp.sum(x1 * x1, axis=-1, keepdims=True), 1e-24))
    u2 = x2 * lax.rsqrt(jnp.maximum(jnp.sum(x2 * x2, axis=-1, keepdims=True), 1e-24))
    n1_ref[...] = (u1 * inv_tau).astype(jnp.bfloat16)
    n2_ref[...] = u2.astype(jnp.bfloat16)
    diag_ref[...] = jnp.sum(u1 * u2, axis=-1, keepdims=True) * inv_tau


def _normalize_and_diag(h1, h2, *, inv_tau, tile):
    n_pad, d = h1.shape
    kernel = functools.partial(_norm_diag_kernel, inv_tau=inv_tau)
    return pl.pallas_call(
        kernel,
        out_shape=(
            jax.ShapeDtypeStruct((n_pad, d), jnp.bfloat16),
            jax.ShapeDtypeStruct((n_pad, d), jnp.bfloat16),
            jax.ShapeDtypeStruct((n_pad, 1), jnp.float32),
        ),
        grid_spec=pltpu.PrefetchScalarGridSpec(
            num_scalar_prefetch=0,
            grid=(n_pad // tile,),
            in_specs=[
                pl.BlockSpec((tile, d), lambda r: (r, 0)),
                pl.BlockSpec((tile, d), lambda r: (r, 0)),
            ],
            out_specs=[
                pl.BlockSpec((tile, d), lambda r: (r, 0)),
                pl.BlockSpec((tile, d), lambda r: (r, 0)),
                pl.BlockSpec((tile, 1), lambda r: (r, 0)),
            ],
        ),
        compiler_params=pltpu.CompilerParams(dimension_semantics=("parallel",)),
    )(h1, h2)


# ---------------------------------------------------------------------------
# 2) Fused symmetric exp-sum kernel.
#    s1[r] = sum_c exp(sim[r, c] - shift)   (h1 -> h2 direction, row sums)
#    s2[c] = sum_r exp(sim[r, c] - shift)   (h2 -> h1 direction, column sums)
#    where sim = (n1/tau) @ n2^T is computed ONCE per tile on the MXU (bf16 in, f32 acc).
#    Both accumulators live directly in (revisited / resident) output blocks.
# ---------------------------------------------------------------------------
def _fused_expsum_kernel(a_ref, b_ref, s1_ref, s2_ref, *, shift):
    i = pl.program_id(0)
    j = pl.program_id(1)

    @pl.when(j == 0)
    def _():
        s1_ref[...] = jnp.zeros_like(s1_ref)          # row-sum block, resident across j

    @pl.when(jnp.logical_and(i == 0, j == 0))
    def _():
        s2_ref[...] = jnp.zeros_like(s2_ref)          # column sums, resident across whole grid

    # (TM, D) x (TK, D) contracting the feature dim of both operands (no in-kernel transpose).
    sim = lax.dot_general(a_ref[...], b_ref[...], (((1,), (1,)), ((), ())),
                          preferred_element_type=jnp.float32)   # (TM, TK), already scaled by 1/tau

    # Fixed-shift exp (stable: unit-norm rows => sim in [-shift, shift]); shared by both
    # reduction directions -> single EUP pass per tile.
    p = jnp.exp(sim - shift)                                     # (TM, TK) in (0, 1]

    s1_ref[...] += jnp.sum(p, axis=-1, keepdims=True)            # (TM, 1)
    s2_ref[j] = s2_ref[j] + jnp.sum(p, axis=0, keepdims=True)    # (1, TK), column-tile j


def _fused_exp_sums(n1_scaled, n2, *, tile_m, tile_k, shift, vmem_limit_bytes):
    n_pad, d = n1_scaled.shape
    assert n2.shape == (n_pad, d)
    assert n_pad % tile_m == 0 and n_pad % tile_k == 0
    num_i = n_pad // tile_m
    num_j = n_pad // tile_k

    kernel = functools.partial(_fused_expsum_kernel, shift=shift)

    cost = pl.CostEstimate(
        flops=2 * n_pad * n_pad * d + 4 * n_pad * n_pad,
        transcendentals=n_pad * n_pad,
        bytes_accessed=2 * n_pad * d * (num_i + 1) + 8 * n_pad,
    )

    s1, s2 = pl.pallas_call(
        kernel,
        out_shape=(
            jax.ShapeDtypeStruct((n_pad, 1), jnp.float32),
            jax.ShapeDtypeStruct((num_j, 1, tile_k), jnp.float32),
        ),
        grid_spec=pltpu.PrefetchScalarGridSpec(
            num_scalar_prefetch=0,
            grid=(num_i, num_j),
            in_specs=[
                pl.BlockSpec((tile_m, d), lambda i, j: (i, 0)),   # anchor row tile (bf16, /tau)
                pl.BlockSpec((tile_k, d), lambda i, j: (j, 0)),   # sample row tile (bf16)
            ],
            out_specs=[
                pl.BlockSpec((tile_m, 1), lambda i, j: (i, 0)),           # row sums
                pl.BlockSpec((num_j, 1, tile_k), lambda i, j: (0, 0, 0)),  # column sums (resident)
            ],
        ),
        compiler_params=pltpu.CompilerParams(
            # Both axes carry cross-tile accumulation (rows across j, columns across i).
            dimension_semantics=("arbitrary", "arbitrary"),
            vmem_limit_bytes=vmem_limit_bytes,
        ),
        cost_estimate=cost,
    )(n1_scaled, n2)
    return s1.reshape(-1), s2.reshape(-1)


# ---------------------------------------------------------------------------
# 3) DualBranchContrast.forward (mode='L2L', intraview_negs='none')
# ---------------------------------------------------------------------------
def dual_branch_contrast_l2l(h1, h2, *, tau=0.5, tile_m=256, tile_k=256):
    n, d = h1.shape
    assert h2.shape == (n, d)
    inv_tau = 1.0 / tau
    shift = inv_tau  # static bound on |cos|/tau for unit-norm rows

    tile_lcm = math.lcm(tile_m, tile_k)
    n_pad = pl.cdiv(n, tile_lcm) * tile_lcm
    if n_pad != n:
        pad = ((0, n_pad - n), (0, 0))
        h1 = jnp.pad(h1, pad)
        h2 = jnp.pad(h2, pad)

    # Normalize both views once (f32 math, bf16 outputs) and get the diagonal sim/tau (f32).
    norm_tile = 512 if n_pad % 512 == 0 else tile_m
    n1_scaled, n2, diag = _normalize_and_diag(h1, h2, inv_tau=inv_tau, tile=norm_tile)

    s1, s2 = _fused_exp_sums(n1_scaled, n2, tile_m=tile_m, tile_k=tile_k,
                             shift=shift, vmem_limit_bytes=48 * 1024 * 1024)

    # O(N) epilogue: strip the exact padding contribution, logsumexp finish, InfoNCE mean.
    diag = diag.reshape(-1)[:n]
    s1 = s1[:n]
    s2 = s2[:n]
    pad_cnt = n_pad - n
    if pad_cnt:
        # Padded rows/cols of sim are exactly 0 => each contributed exp(0 - shift) to the sums.
        s1 = s1 - pad_cnt * math.exp(-shift)
        s2 = s2 - pad_cnt * math.exp(-shift)
    lse1 = jnp.log(s1) + shift
    lse2 = jnp.log(s2) + shift
    return 0.5 * (jnp.mean(lse1 - diag) + jnp.mean(lse2 - diag))


# ---------------------------------------------------------------------------
# Pure-JAX reference (f32 throughout)
# ---------------------------------------------------------------------------
def _reference(h1, h2, tau):
    def norm(x):
        return x / jnp.maximum(jnp.linalg.norm(x, axis=-1, keepdims=True), 1e-12)

    def one_side(a, b):
        sim = norm(a) @ norm(b).T / tau
        lse = jax.scipy.special.logsumexp(sim, axis=-1)
        return jnp.mean(lse - jnp.diag(sim))

    return 0.5 * (one_side(h1, h2) + one_side(h2, h1))


if __name__ == "__main__":
    tau = 0.5
    key = jax.random.PRNGKey(0)

    # (128,32)/(100,32): single-tile grid (exact / padded); (512,64): multi-tile accumulation;
    # (700,48): multi-tile + padding correction path.
    for n, d in [(128, 32), (100, 32), (512, 64), (700, 48)]:
        k1, k2 = jax.random.split(jax.random.fold_in(key, n))
        h1 = jax.random.normal(k1, (n, d), dtype=jnp.float32)
        h2 = jax.random.normal(k2, (n, d), dtype=jnp.float32)

        loss = jax.block_until_ready(dual_branch_contrast_l2l(h1, h2, tau=tau))
        ref = _reference(h1, h2, tau)

        assert jnp.isfinite(loss), (n, loss)
        # bf16 MXU operands => ~1e-3-level agreement with the f32 reference.
        assert jnp.allclose(loss, ref, rtol=1e-2, atol=1e-2), (n, loss, ref)

    print("KERNEL_OK")
</pallas_src>

<mosaic_0001>
module attributes {stable_mosaic.version = 11 : i64} {
  func.func @_norm_diag_kernel(%arg0: i32, %arg1: memref<256x32xf32, #tpu.memory_space<vmem>>, %arg2: memref<256x32xf32, #tpu.memory_space<vmem>>, %arg3: memref<256x32xbf16, #tpu.memory_space<vmem>>, %arg4: memref<256x32xbf16, #tpu.memory_space<vmem>>, %arg5: memref<256x1xf32, #tpu.memory_space<vmem>>) attributes {dimension_semantics = [#tpu.dimension_semantics<parallel>], iteration_bounds = array<i64: 1>, scalar_prefetch = 0 : i64, scratch_operands = 0 : i64, tpu.core_type = #tpu.core_type<tc>, window_params = [{transform_indices = @transform_0, window_bounds = array<i64: 256, 32>}, {transform_indices = @transform_1, window_bounds = array<i64: 256, 32>}, {transform_indices = @transform_2, window_bounds = array<i64: 256, 32>}, {transform_indices = @transform_3, window_bounds = array<i64: 256, 32>}, {transform_indices = @transform_4, window_bounds = array<i64: 256, 1>}]} {
    %c0 = arith.constant 0 : index
    %c0_0 = arith.constant 0 : index
    %0 = vector.load %arg1[%c0, %c0_0] : memref<256x32xf32, #tpu.memory_space<vmem>>, vector<256x32xf32>
    %c0_1 = arith.constant 0 : index
    %c0_2 = arith.constant 0 : index
    %1 = vector.load %arg2[%c0_1, %c0_2] : memref<256x32xf32, #tpu.memory_space<vmem>>, vector<256x32xf32>
    %2 = arith.mulf %0, %0 : vector<256x32xf32>
    %cst = arith.constant dense<0.000000e+00> : vector<256xf32>
    %3 = vector.multi_reduction <add>, %2, %cst [1] : vector<256x32xf32> to vector<256xf32>
    %4 = vector.shape_cast %3 : vector<256xf32> to vector<256x1xf32>
    %cst_3 = arith.constant 1.000000e-24 : f32
    %5 = vector.broadcast %cst_3 : f32 to vector<256x1xf32>
    %6 = arith.maximumf %4, %5 : vector<256x1xf32>
    %7 = math.rsqrt %6 : vector<256x1xf32>
    %8 = vector.broadcast %7 : vector<256x1xf32> to vector<256x32xf32>
    %9 = arith.mulf %0, %8 : vector<256x32xf32>
    %10 = arith.mulf %1, %1 : vector<256x32xf32>
    %cst_4 = arith.constant dense<0.000000e+00> : vector<256xf32>
    %11 = vector.multi_reduction <add>, %10, %cst_4 [1] : vector<256x32xf32> to vector<256xf32>
    %12 = vector.shape_cast %11 : vector<256xf32> to vector<256x1xf32>
    %cst_5 = arith.constant 1.000000e-24 : f32
    %13 = vector.broadcast %cst_5 : f32 to vector<256x1xf32>
    %14 = arith.maximumf %12, %13 : vector<256x1xf32>
    %15 = math.rsqrt %14 : vector<256x1xf32>
    %16 = vector.broadcast %15 : vector<256x1xf32> to vector<256x32xf32>
    %17 = arith.mulf %1, %16 : vector<256x32xf32>
    %cst_6 = arith.constant 2.000000e+00 : f32
    %18 = vector.broadcast %cst_6 : f32 to vector<256x32xf32>
    %19 = arith.mulf %9, %18 : vector<256x32xf32>
    %20 = arith.truncf %19 : vector<256x32xf32> to vector<256x32xbf16>
    %c0_7 = arith.constant 0 : index
    %c0_8 = arith.constant 0 : index
    %21 = vector.load %arg3[%c0_7, %c0_8] : memref<256x32xbf16, #tpu.memory_space<vmem>>, vector<256x32xbf16>
    tpu.vector_store %arg3[%c0_7, %c0_8], %20 {strides = array<i32>} : memref<256x32xbf16, #tpu.memory_space<vmem>>, vector<256x32xbf16>,
    %22 = arith.truncf %17 : vector<256x32xf32> to vector<256x32xbf16>
    %c0_9 = arith.constant 0 : index
    %c0_10 = arith.constant 0 : index
    %23 = vector.load %arg4[%c0_9, %c0_10] : memref<256x32xbf16, #tpu.memory_space<vmem>>, vector<256x32xbf16>
    tpu.vector_store %arg4[%c0_9, %c0_10], %22 {strides = array<i32>} : memref<256x32xbf16, #tpu.memory_space<vmem>>, vector<256x32xbf16>,
    %24 = arith.mulf %9, %17 : vector<256x32xf32>
    %cst_11 = arith.constant dense<0.000000e+00> : vector<256xf32>
    %25 = vector.multi_reduction <add>, %24, %cst_11 [1] : vector<256x32xf32> to vector<256xf32>
    %26 = vector.shape_cast %25 : vector<256xf32> to vector<256x1xf32>
    %cst_12 = arith.constant 2.000000e+00 : f32
    %27 = vector.broadcast %cst_12 : f32 to vector<256x1xf32>
    %28 = arith.mulf %26, %27 : vector<256x1xf32>
    %c0_13 = arith.constant 0 : index
    %c0_14 = arith.constant 0 : index
    %29 = vector.load %arg5[%c0_13, %c0_14] : memref<256x1xf32, #tpu.memory_space<vmem>>, vector<256x1xf32>
    tpu.vector_store %arg5[%c0_13, %c0_14], %28 {strides = array<i32>} : memref<256x1xf32, #tpu.memory_space<vmem>>, vector<256x1xf32>,
    return
  }
  func.func @transform_0(%arg0: i32) -> (i32, i32) {
    %c0_i32 = arith.constant 0 : i32
    %c0_i32_0 = arith.constant 0 : i32
    return %arg0, %c0_i32 : i32, i32
  }
  func.func @transform_1(%arg0: i32) -> (i32, i32) {
    %c0_i32 = arith.constant 0 : i32
    %c0_i32_0 = arith.constant 0 : i32
    return %arg0, %c0_i32 : i32, i32
  }
  func.func @transform_2(%arg0: i32) -> (i32, i32) {
    %c0_i32 = arith.constant 0 : i32
    %c0_i32_0 = arith.constant 0 : i32
    return %arg0, %c0_i32 : i32, i32
  }
  func.func @transform_3(%arg0: i32) -> (i32, i32) {
    %c0_i32 = arith.constant 0 : i32
    %c0_i32_0 = arith.constant 0 : i32
    return %arg0, %c0_i32 : i32, i32
  }
  func.func @transform_4(%arg0: i32) -> (i32, i32) {
    %c0_i32 = arith.constant 0 : i32
    %c0_i32_0 = arith.constant 0 : i32
    return %arg0, %c0_i32 : i32, i32
  }
}

</mosaic_0001>

<bundles_post_ra>
// kernel: tpu_custom_call.1
= control target key start
LH: loop header
LB: loop body
LE: loop exit
PB: predicated region body
PF: predicated region fallthrough
CT: control target
= control target key end

     0   :  { %vm110_vm0 = vcmask 261120   ;;  %vm687_vm1 = vcmask 257024   ;;  %vm1040_vm2 = vcmask 7168   ;;  %s2471_s0 = inlined_call_operand.vmem [shape: f32[256,32], index: 0, kind: input, shape index: {}]   ;;  %s2472_s1 = inlined_call_operand.vmem [shape: f32[256,32], index: 1, kind: input, shape index: {}]   ;;  %s2473_s2 = inlined_call_operand.vmem [shape: bf16[256,32], index: 2, kind: output, shape index: {0}]   ;;  %s2474_s3 = inlined_call_operand.vmem [shape: bf16[256,32], index: 3, kind: output, shape index: {1}]   ;;  %s2475_s4 = inlined_call_operand.vmem [shape: f32[256,1], index: 4, kind: output, shape index: {2}]  }
   0x1   :  { %v1384_v0 = vld [vmem:[%s2471_s0 + $0x10] sm:$0xff]  ;;  %v1389_v1 = vld [vmem:[%s2471_s0] sm:$0xff]  ;;  %v1394_v2 = vld [vmem:[%s2471_s0 + $0x18] sm:$0xff] }
   0x2   :  { %v80_v3 = vmul.f32 %v1384_v0, %v1384_v0  ;;  %v78_v4 = vmul.f32 %v1389_v1, %v1389_v1  ;;  %v81_v5 = vmul.f32 %v1394_v2, %v1394_v2  ;;  %v1405_v6 = vld [vmem:[%s2471_s0 + $0x8] sm:$0xff]  ;;  %v1417_v9 = vld [vmem:[%s2471_s0 + $0x20] sm:$0xff]  ;;  %v1430_v16 = vld [vmem:[%s2471_s0 + $0x38] sm:$0xff] }
   0x3   :  { %v79_v7 = vmul.f32 %v1405_v6, %v1405_v6  ;;  %v1412_v8 = vld [vmem:[%s2471_s0 + $0x28] sm:$0xff]  ;;  %v82_v15 = vmul.f32 %v1417_v9, %v1417_v9  ;;  %v1435_v17 = vld [vmem:[%s2471_s0 + $0x30] sm:$0xff]  ;;  %v85_v20 = vmul.f32 %v1430_v16, %v1430_v16  ;;  %v1451_v23 = vld [vmem:[%s2471_s0 + $0x40] sm:$0xff] }
   0x4   :  { %v117_v10 = vsel %vm110_vm0, %v80_v3, 0.0  ;;  %v111_v11 = vsel %vm110_vm0, %v78_v4, 0.0  ;;  %v120_v12 = vsel %vm110_vm0, %v81_v5, 0.0  ;;  %v83_v14 = vmul.f32 %v1412_v8, %v1412_v8  ;;  %v1446_v22 = vld [vmem:[%s2471_s0 + $0x48] sm:$0xff]  ;;  %v1462_v28 = vld [vmem:[%s2471_s0 + $0x58] sm:$0xff]  ;;  %v1467_v29 = vld [vmem:[%s2471_s0 + $0x50] sm:$0xff] }
   0x5   :  { %118 = vadd.xlane.f32.xlu1 %v117_v10  ;;  %112 = vadd.xlane.f32.xlu0 %v111_v11  ;;  %v114_v13 = vsel %vm110_vm0, %v79_v7, 0.0  ;;  %v123_v19 = vsel %vm110_vm0, %v82_v15, 0.0  ;;  %v84_v21 = vmul.f32 %v1435_v17, %v1435_v17  ;;  %v132_v24 = vsel %vm110_vm0, %v85_v20, 0.0  ;;  %v1478_v34 = vld [vmem:[%s2471_s0 + $0x68] sm:$0xff]  ;;  %v1483_v35 = vld [vmem:[%s2471_s0 + $0x60] sm:$0xff]  ;;  %v1494_v40 = vld [vmem:[%s2471_s0 + $0x78] sm:$0xff] }
   0x6   :  { %v126_v18 = vsel %vm110_vm0, %v83_v14, 0.0  ;;  %v87_v26 = vmul.f32 %v1446_v22, %v1446_v22  ;;  %v86_v27 = vmul.f32 %v1451_v23, %v1451_v23  ;;  %v89_v32 = vmul.f32 %v1462_v28, %v1462_v28  ;;  %v1499_v41 = vld [vmem:[%s2471_s0 + $0x70] sm:$0xff]  ;;  %v1510_v46 = vld [vmem:[%s2471_s0 + $0x88] sm:$0xff]  ;;  %v1515_v47 = vld [vmem:[%s2471_s0 + $0x80] sm:$0xff] }
   0x7   :  { %v129_v25 = vsel %vm110_vm0, %v84_v21, 0.0  ;;  %v88_v33 = vmul.f32 %v1467_v29, %v1467_v29  ;;  %v91_v38 = vmul.f32 %v1478_v34, %v1478_v34  ;;  %v90_v39 = vmul.f32 %v1483_v35, %v1483_v35  ;;  %v1526_v52 = vld [vmem:[%s2471_s0 + $0x98] sm:$0xff]  ;;  %v1531_v53 = vld [vmem:[%s2471_s0 + $0x90] sm:$0xff]  ;;  %v1542_v58 = vld [vmem:[%s2471_s0 + $0xa8] sm:$0xff] }
   0x8   :  { %v138_v30 = vsel %vm110_vm0, %v87_v26, 0.0  ;;  %v135_v31 = vsel %vm110_vm0, %v86_v27, 0.0  ;;  %v144_v36 = vsel %vm110_vm0, %v89_v32, 0.0  ;;  %v93_v44 = vmul.f32 %v1494_v40, %v1494_v40  ;;  %v1547_v59 = vld [vmem:[%s2471_s0 + $0xa0] sm:$0xff]  ;;  %v1558_v3 = vld [vmem:[%s2471_s0 + $0xb8] sm:$0xff]  ;;  %v1563_v4 = vld [vmem:[%s2471_s0 + $0xb0] sm:$0xff] }
   0x9   :  { %121 = vadd.xlane.f32.xlu1 %v120_v12  ;;  %115 = vadd.xlane.f32.xlu0 %v114_v13  ;;  %v141_v37 = vsel %vm110_vm0, %v88_v33, 0.0  ;;  %v150_v42 = vsel %vm110_vm0, %v91_v38, 0.0  ;;  %v147_v43 = vsel %vm110_vm0, %v90_v39, 0.0  ;;  %v92_v45 = vmul.f32 %v1499_v41, %v1499_v41  ;;  %v1574_v12 = vld [vmem:[%s2471_s0 + $0xc8] sm:$0xff]  ;;  %v1579_v13 = vld [vmem:[%s2471_s0 + $0xc0] sm:$0xff]  ;;  %v1590_v20 = vld [vmem:[%s2471_s0 + $0xd8] sm:$0xff] }
   0xa   :  { %v156_v48 = vsel %vm110_vm0, %v93_v44, 0.0  ;;  %v95_v50 = vmul.f32 %v1510_v46, %v1510_v46  ;;  %v94_v51 = vmul.f32 %v1515_v47, %v1515_v47  ;;  %v97_v56 = vmul.f32 %v1526_v52, %v1526_v52  ;;  %v1595_v21 = vld [vmem:[%s2471_s0 + $0xd0] sm:$0xff]  ;;  %v1622_v38 = vld [vmem:[%s2471_s0 + $0xf8] sm:$0xff] }
   0xb   :  { %v153_v49 = vsel %vm110_vm0, %v92_v45, 0.0  ;;  %v96_v57 = vmul.f32 %v1531_v53, %v1531_v53  ;;  %v99_v62 = vmul.f32 %v1542_v58, %v1542_v58  ;;  %v98_v63 = vmul.f32 %v1547_v59, %v1547_v59  ;;  %v1627_v39 = vld [vmem:[%s2471_s0 + $0xf0] sm:$0xff] }
   0xc   :  { %v162_v54 = vsel %vm110_vm0, %v95_v50, 0.0  ;;  %v159_v55 = vsel %vm110_vm0, %v94_v51, 0.0  ;;  %v168_v60 = vsel %vm110_vm0, %v97_v56, 0.0  ;;  %v101_v10 = vmul.f32 %v1558_v3, %v1558_v3  ;;  %v1654_v56 = vld [vmem:[%s2472_s1 + $0x18] sm:$0xff] }
   0xd   :  { %127 = vadd.xlane.f32.xlu1 %v126_v18  ;;  %124 = vadd.xlane.f32.xlu0 %v123_v19  ;;  %v165_v61 = vsel %vm110_vm0, %v96_v57, 0.0  ;;  %v174_v5 = vsel %vm110_vm0, %v99_v62, 0.0  ;;  %v171_v7 = vsel %vm110_vm0, %v98_v63, 0.0  ;;  %v100_v11 = vmul.f32 %v1563_v4, %v1563_v4  ;;  %v1659_v57 = vld [vmem:[%s2472_s1 + $0x10] sm:$0xff] }
   0xe   :  { %v180_v14 = vsel %vm110_vm0, %v101_v10, 0.0  ;;  %v103_v18 = vmul.f32 %v1574_v12, %v1574_v12  ;;  %v102_v19 = vmul.f32 %v1579_v13, %v1579_v13  ;;  %v105_v26 = vmul.f32 %v1590_v20, %v1590_v20 }
   0xf   :  { %v177_v15 = vsel %vm110_vm0, %v100_v11, 0.0  ;;  %v104_v27 = vmul.f32 %v1595_v21, %v1595_v21  ;;  %v109_v44 = vmul.f32 %v1622_v38, %v1622_v38  ;;  %v108_v45 = vmul.f32 %v1627_v39, %v1627_v39 }
  0x10   :  { %v192_v32 = vsel %vm110_vm0, %v105_v26, 0.0  ;;  %v306_v62 = vmul.f32 %v1654_v56, %v1654_v56  ;;  %v305_v63 = vmul.f32 %v1659_v57, %v1659_v57 }
  0x11   :  { %133 = vadd.xlane.f32.xlu1 %v132_v24  ;;  %130 = vadd.xlane.f32.xlu0 %v129_v25  ;;  %v186_v24 = vsel %vm110_vm0, %v103_v18, 0.0  ;;  %v183_v25 = vsel %vm110_vm0, %v102_v19, 0.0  ;;  %v189_v33 = vsel %vm110_vm0, %v104_v27, 0.0  ;;  %v204_v50 = vsel %vm110_vm0, %v109_v44, 0.0  ;;  %v1686_v18 = vld [vmem:[%s2472_s1 + $0x38] sm:$0xff]  ;;  %v1691_v19 = vld [vmem:[%s2472_s1 + $0x30] sm:$0xff] }
  0x12   :  { %v201_v51 = vsel %vm110_vm0, %v108_v45, 0.0  ;;  %v344_v10 = vsel %vm110_vm0, %v306_v62, 0.0  ;;  %v341_v11 = vsel %vm110_vm0, %v305_v63, 0.0  ;;  %v310_v26 = vmul.f32 %v1686_v18, %v1686_v18  ;;  %v1718_v44 = vld [vmem:[%s2472_s1 + $0x58] sm:$0xff]  ;;  %v1723_v45 = vld [vmem:[%s2472_s1 + $0x50] sm:$0xff] }
  0x13   :  { %v309_v27 = vmul.f32 %v1691_v19, %v1691_v19 }
  0x15   :  { %139 = vadd.xlane.f32.xlu1 %v138_v30  ;;  %136 = vadd.xlane.f32.xlu0 %v135_v31  ;;  %v1606_v30 = vld [vmem:[%s2471_s0 + $0xe8] sm:$0xff]  ;;  %v1611_v31 = vld [vmem:[%s2471_s0 + $0xe0] sm:$0xff] }
  0x19   :  { %145 = vadd.xlane.f32.xlu1 %v144_v36  ;;  %142 = vadd.xlane.f32.xlu0 %v141_v37  ;;  %v107_v36 = vmul.f32 %v1606_v30, %v1606_v30  ;;  %v106_v37 = vmul.f32 %v1611_v31, %v1611_v31 }
  0x1d   :  { %151 = vadd.xlane.f32.xlu1 %v150_v42  ;;  %148 = vadd.xlane.f32.xlu0 %v147_v43  ;;  %v198_v42 = vsel %vm110_vm0, %v107_v36, 0.0  ;;  %v195_v43 = vsel %vm110_vm0, %v106_v37, 0.0  ;;  %v356_v36 = vsel %vm110_vm0, %v310_v26, 0.0  ;;  %v353_v37 = vsel %vm110_vm0, %v309_v27, 0.0 }
  0x21   :  { %157 = vadd.xlane.f32.xlu1 %v156_v48  ;;  %154 = vadd.xlane.f32.xlu0 %v153_v49  ;;  %v1638_v48 = vld [vmem:[%s2472_s1 + $0x8] sm:$0xff]  ;;  %v1643_v49 = vld [vmem:[%s2472_s1] sm:$0xff] }
  0x25   :  { %163 = vadd.xlane.f32.xlu1 %v162_v54  ;;  %160 = vadd.xlane.f32.xlu0 %v159_v55  ;;  %v304_v54 = vmul.f32 %v1638_v48, %v1638_v48  ;;  %v303_v55 = vmul.f32 %v1643_v49, %v1643_v49 }
  0x29   :  { %169 = vadd.xlane.f32.xlu1 %v168_v60  ;;  %166 = vadd.xlane.f32.xlu0 %v165_v61  ;;  %v338_v60 = vsel %vm110_vm0, %v304_v54, 0.0  ;;  %v335_v61 = vsel %vm110_vm0, %v303_v55, 0.0  ;;  %v314_v54 = vmul.f32 %v1718_v44, %v1718_v44  ;;  %v313_v55 = vmul.f32 %v1723_v45, %v1723_v45 }
  0x2b   :  { %v368_v62 = vsel %vm110_vm0, %v314_v54, 0.0  ;;  %v365_v63 = vsel %vm110_vm0, %v313_v55, 0.0  ;;  %v65_v54 = vld [vmem:[%s2472_s1 + $0x98] sm:$0xff]  ;;  %v64_v55 = vld [vmem:[%s2472_s1 + $0x90] sm:$0xff] }
  0x2d   :  { %175 = vadd.xlane.f32.xlu1 %v174_v5  ;;  %172 = vadd.xlane.f32.xlu0 %v171_v7  ;;  %v1670_v5 = vld [vmem:[%s2472_s1 + $0x28] sm:$0xff]  ;;  %v1675_v7 = vld [vmem:[%s2472_s1 + $0x20] sm:$0xff] }
  0x31   :  { %181 = vadd.xlane.f32.xlu1 %v180_v14  ;;  %178 = vadd.xlane.f32.xlu0 %v177_v15  ;;  %v308_v14 = vmul.f32 %v1670_v5, %v1670_v5  ;;  %v307_v15 = vmul.f32 %v1675_v7, %v1675_v7 }
  0x35   :  { %187 = vadd.xlane.f32.xlu1 %v186_v24  ;;  %184 = vadd.xlane.f32.xlu0 %v183_v25  ;;  %v350_v24 = vsel %vm110_vm0, %v308_v14, 0.0  ;;  %v347_v25 = vsel %vm110_vm0, %v307_v15, 0.0  ;;  %v1750_v14 = vld [vmem:[%s2472_s1 + $0x78] sm:$0xff]  ;;  %v1755_v15 = vld [vmem:[%s2472_s1 + $0x70] sm:$0xff] }
  0x36   :  { %v318_v26 = vmul.f32 %v1750_v14, %v1750_v14  ;;  %v317_v27 = vmul.f32 %v1755_v15, %v1755_v15 }
  0x39   :  { %193 = vadd.xlane.f32.xlu1 %v192_v32  ;;  %190 = vadd.xlane.f32.xlu0 %v189_v33  ;;  %v1702_v32 = vld [vmem:[%s2472_s1 + $0x48] sm:$0xff]  ;;  %v1707_v33 = vld [vmem:[%s2472_s1 + $0x40] sm:$0xff] }
  0x3d   :  { %199 = vadd.xlane.f32.xlu1 %v198_v42  ;;  %196 = vadd.xlane.f32.xlu0 %v195_v43  ;;  %v312_v42 = vmul.f32 %v1702_v32, %v1702_v32  ;;  %v311_v43 = vmul.f32 %v1707_v33, %v1707_v33 }
  0x41   :  { %205 = vadd.xlane.f32.xlu1 %v204_v50  ;;  %202 = vadd.xlane.f32.xlu0 %v201_v51  ;;  %v362_v50 = vsel %vm110_vm0, %v312_v42, 0.0  ;;  %v359_v51 = vsel %vm110_vm0, %v311_v43, 0.0  ;;  %v380_v42 = vsel %vm110_vm0, %v318_v26, 0.0  ;;  %v377_v43 = vsel %vm110_vm0, %v317_v27, 0.0 }
  0x45   :  { %339 = vadd.xlane.f32.xlu1 %v338_v60  ;;  %336 = vadd.xlane.f32.xlu0 %v335_v61  ;;  %v1734_v60 = vld [vmem:[%s2472_s1 + $0x68] sm:$0xff]  ;;  %v1739_v61 = vld [vmem:[%s2472_s1 + $0x60] sm:$0xff] }
  0x49   :  { %345 = vadd.xlane.f32.xlu1 %v344_v10  ;;  %342 = vadd.xlane.f32.xlu0 %v341_v11  ;;  %v316_v10 = vmul.f32 %v1734_v60, %v1734_v60  ;;  %v315_v11 = vmul.f32 %v1739_v61, %v1739_v61 }
  0x4d   :  { %351 = vadd.xlane.f32.xlu1 %v350_v24  ;;  %348 = vadd.xlane.f32.xlu0 %v347_v25  ;;  %v374_v24 = vsel %vm110_vm0, %v316_v10, 0.0  ;;  %v371_v25 = vsel %vm110_vm0, %v315_v11, 0.0  ;;  %v322_v10 = vmul.f32 %v65_v54, %v65_v54  ;;  %v321_v11 = vmul.f32 %v64_v55, %v64_v55 }
  0x4f   :  { %v392_v26 = vsel %vm110_vm0, %v322_v10, 0.0  ;;  %v389_v27 = vsel %vm110_vm0, %v321_v11, 0.0  ;;  %v70_v10 = vld [vmem:[%s2472_s1 + $0xc0] sm:$0xff] }
  0x51   :  { %357 = vadd.xlane.f32.xlu1 %v356_v36  ;;  %354 = vadd.xlane.f32.xlu0 %v353_v37  ;;  %v1766_v36 = vld [vmem:[%s2472_s1 + $0x88] sm:$0xff]  ;;  %v62_v37 = vld [vmem:[%s2472_s1 + $0x80] sm:$0xff] }
  0x52   :  { %2478 = vst [vmem:[#allocation2_spill] sm:$0xff] %v1766_v36 }
  0x55   :  { %363 = vadd.xlane.f32.xlu1 %v362_v50  ;;  %360 = vadd.xlane.f32.xlu0 %v359_v51  ;;  %v320_v50 = vmul.f32 %v1766_v36, %v1766_v36  ;;  %v319_v51 = vmul.f32 %v62_v37, %v62_v37 }
  0x59   :  { %369 = vadd.xlane.f32.xlu1 %v368_v62  ;;  %366 = vadd.xlane.f32.xlu0 %v365_v63  ;;  %v386_v62 = vsel %vm110_vm0, %v320_v50, 0.0  ;;  %v383_v63 = vsel %vm110_vm0, %v319_v51, 0.0  ;;  %v68_v50 = vld [vmem:[%s2472_s1 + $0xb0] sm:$0xff] }
  0x5d   :  { %375 = vadd.xlane.f32.xlu1 %v374_v24  ;;  %372 = vadd.xlane.f32.xlu0 %v371_v25  ;;  %v67_v24 = vld [vmem:[%s2472_s1 + $0xa8] sm:$0xff]  ;;  %v66_v25 = vld [vmem:[%s2472_s1 + $0xa0] sm:$0xff] }
  0x5e   :  { %v324_v37 = vmul.f32 %v67_v24, %v67_v24 }
  0x60   :  { %v398_v51 = vsel %vm110_vm0, %v324_v37, 0.0  ;;  %v72_v37 = vld [vmem:[%s2472_s1 + $0xd0] sm:$0xff] }
  0x61   :  { %381 = vadd.xlane.f32.xlu1 %v380_v42  ;;  %378 = vadd.xlane.f32.xlu0 %v377_v43  ;;  %v323_v42 = vmul.f32 %v66_v25, %v66_v25  ;;  %v69_v43 = vld [vmem:[%s2472_s1 + $0xb8] sm:$0xff] }
  0x62   :  { %v326_v55 = vmul.f32 %v69_v43, %v69_v43 }
  0x63   :  { %v395_v54 = vsel %vm110_vm0, %v323_v42, 0.0 }
  0x64   :  { %v404_v11 = vsel %vm110_vm0, %v326_v55, 0.0  ;;  %v74_v55 = vld [vmem:[%s2472_s1 + $0xe0] sm:$0xff] }
  0x65   :  { %387 = vadd.xlane.f32.xlu1 %v386_v62  ;;  %384 = vadd.xlane.f32.xlu0 %v383_v63  ;;  %v325_v62 = vmul.f32 %v68_v50, %v68_v50  ;;  %v71_v63 = vld [vmem:[%s2472_s1 + $0xc8] sm:$0xff] }
  0x66   :  { %v328_v25 = vmul.f32 %v71_v63, %v71_v63 }
  0x67   :  { %v401_v24 = vsel %vm110_vm0, %v325_v62, 0.0 }
  0x68   :  { %v410_v42 = vsel %vm110_vm0, %v328_v25, 0.0  ;;  %v76_v25 = vld [vmem:[%s2472_s1 + $0xf0] sm:$0xff] }
  0x69   :  { %393 = vadd.xlane.f32.xlu1 %v392_v26  ;;  %390 = vadd.xlane.f32.xlu0 %v389_v27  ;;  %v327_v26 = vmul.f32 %v70_v10, %v70_v10  ;;  %v73_v27 = vld [vmem:[%s2472_s1 + $0xd8] sm:$0xff] }
  0x6a   :  { %v330_v50 = vmul.f32 %v73_v27, %v73_v27 }
  0x6b   :  { %v407_v43 = vsel %vm110_vm0, %v327_v26, 0.0 }
  0x6c   :  { %v416_v62 = vsel %vm110_vm0, %v330_v50, 0.0 }
  0x6d   :  { %399 = vadd.xlane.f32.xlu1 %v398_v51  ;;  %396 = vadd.xlane.f32.xlu0 %v395_v54  ;;  %v329_v51 = vmul.f32 %v72_v37, %v72_v37  ;;  %v75_v54 = vld [vmem:[%s2472_s1 + $0xe8] sm:$0xff] }
  0x6e   :  { %v332_v10 = vmul.f32 %v75_v54, %v75_v54 }
  0x6f   :  { %v413_v63 = vsel %vm110_vm0, %v329_v51, 0.0 }
  0x70   :  { %v422_v26 = vsel %vm110_vm0, %v332_v10, 0.0 }
  0x71   :  { %405 = vadd.xlane.f32.xlu1 %v404_v11  ;;  %402 = vadd.xlane.f32.xlu0 %v401_v24  ;;  %v331_v11 = vmul.f32 %v74_v55, %v74_v55  ;;  %v77_v24 = vld [vmem:[%s2472_s1 + $0xf8] sm:$0xff] }
  0x72   :  { %v334_v37 = vmul.f32 %v77_v24, %v77_v24 }
  0x73   :  { %v419_v27 = vsel %vm110_vm0, %v331_v11, 0.0 }
  0x75   :  { %411 = vadd.xlane.f32.xlu1 %v410_v42  ;;  %408 = vadd.xlane.f32.xlu0 %v407_v43  ;;  %v333_v42 = vmul.f32 %v76_v25, %v76_v25  ;;  %v428_v43 = vsel %vm110_vm0, %v334_v37, 0.0 }
  0x77   :  { %v425_v50 = vsel %vm110_vm0, %v333_v42, 0.0 }
  0x79   :  { %417 = vadd.xlane.f32.xlu1 %v416_v62  ;;  %414 = vadd.xlane.f32.xlu0 %v413_v63 }
  0x7d   :  { %423 = vadd.xlane.f32.xlu1 %v422_v26  ;;  %420 = vadd.xlane.f32.xlu0 %v419_v27 }
  0x81   :  { %429 = vadd.xlane.f32.xlu1 %v428_v43  ;;  %426 = vadd.xlane.f32.xlu0 %v425_v50 }
  0x92   :  { %v119_v51 = vpop.xlane.xlu1 %118  ;;  %v113_v54 = vpop.xlane.xlu0 %112 }
  0x93   :  { %v209_v55 = vmax.f32 %v119_v51, 1e-24  ;;  %v207_v36 = vmax.f32 %v113_v54, 1e-24 }
  0x95   :  { %1213 = vrsqrt.f32 %v209_v55 }
  0x96   :  { %1215 = vrsqrt.f32 %v207_v36  ;;  %v122_v62 = vpop.xlane.xlu1 %121  ;;  %v116_v63 = vpop.xlane.xlu0 %115 }
  0x97   :  { %v210_v10 = vmax.f32 %v122_v62, 1e-24  ;;  %v208_v11 = vmax.f32 %v116_v63, 1e-24 }
  0x99   :  { %1217 = vrsqrt.f32 %v210_v10 }
  0x9a   :  { %1219 = vrsqrt.f32 %v208_v11  ;;  %v128_v24 = vpop.xlane.xlu1 %127  ;;  %v125_v25 = vpop.xlane.xlu0 %124 }
  0x9b   :  { %v212_v26 = vmax.f32 %v128_v24, 1e-24  ;;  %v211_v27 = vmax.f32 %v125_v25, 1e-24 }
  0x9d   :  { %1221 = vrsqrt.f32 %v212_v26 }
  0x9e   :  { %1223 = vrsqrt.f32 %v211_v27  ;;  %v134_v37 = vpop.xlane.xlu1 %133  ;;  %v131_v42 = vpop.xlane.xlu0 %130 }
  0x9f   :  { %v1214_v43 = vpop.eup %1213  ;;  %v214_v50 = vmax.f32 %v134_v37, 1e-24  ;;  %v213_v51 = vmax.f32 %v131_v42, 1e-24 }
  0xa0   :  { %v1216_v54 = vpop.eup %1215  ;;  %v1834_v36 = vmul.f32 %v1214_v43, %v1384_v0 }
  0xa1   :  { %1225 = vrsqrt.f32 %v214_v50  ;;  %v1837_v55 = vmul.f32 %v1216_v54, %v1389_v1 }
  0xa2   :  { %1227 = vrsqrt.f32 %v213_v51  ;;  %v140_v62 = vpop.xlane.xlu1 %139  ;;  %v137_v63 = vpop.xlane.xlu0 %136  ;;  %v529_v10 = vmul.f32 2.0, %v1834_v36 }
  0xa3   :  { %v1218_v11 = vpop.eup %1217  ;;  %v216_v24 = vmax.f32 %v140_v62, 1e-24  ;;  %v215_v25 = vmax.f32 %v137_v63, 1e-24  ;;  %v527_v26 = vmul.f32 2.0, %v1837_v55 }
  0xa4   :  { %v1220_v27 = vpop.eup %1219  ;;  %v1842_v37 = vmul.f32 %v1218_v11, %v1394_v2  ;;  %v1151_v0 = vpack.c.bf16 %v529_v10, %v529_v10 }
  0xa5   :  { %1229 = vrsqrt.f32 %v216_v24  ;;  %v1845_v1 = vmul.f32 %v1220_v27, %v1405_v6  ;;  %v1149_v42 = vpack.c.bf16 %v527_v26, %v527_v26 }
  0xa6   :  { %1231 = vrsqrt.f32 %v215_v25  ;;  %v146_v43 = vpop.xlane.xlu1 %145  ;;  %v143_v50 = vpop.xlane.xlu0 %142  ;;  %v530_v51 = vmul.f32 2.0, %v1842_v37  ;;  %690 = vst.msk [vmem:[%s2473_s2 + $0x8] sm:$0xf] %vm687_vm1, %v1151_v0 }
  0xa7   :  { %v1222_v54 = vpop.eup %1221  ;;  %v218_v62 = vmax.f32 %v146_v43, 1e-24  ;;  %v217_v2 = vmax.f32 %v143_v50, 1e-24  ;;  %v528_v63 = vmul.f32 2.0, %v1845_v1 }
  0xa8   :  { %688 = vst.msk [vmem:[%s2473_s2] sm:$0xf] %vm687_vm1, %v1149_v42  ;;  %v1224_v6 = vpop.eup %1223  ;;  %v1152_v10 = vpack.c.bf16 %v530_v51, %v530_v51  ;;  %v1858_v11 = vmul.f32 %v1222_v54, %v1412_v8 }
  0xa9   :  { %1233 = vrsqrt.f32 %v218_v62  ;;  %v1150_v24 = vpack.c.bf16 %v528_v63, %v528_v63  ;;  %v1861_v25 = vmul.f32 %v1224_v6, %v1417_v9 }
  0xaa   :  { %1235 = vrsqrt.f32 %v217_v2  ;;  %v152_v26 = vpop.xlane.xlu1 %151  ;;  %v149_v27 = vpop.xlane.xlu0 %148  ;;  %691 = vst.msk [vmem:[%s2473_s2 + $0xc] sm:$0xf] %vm687_vm1, %v1152_v10  ;;  %v532_v0 = vmul.f32 2.0, %v1858_v11 }
  0xab   :  { %v1226_v42 = vpop.eup %1225  ;;  %v220_v43 = vmax.f32 %v152_v26, 1e-24  ;;  %v219_v50 = vmax.f32 %v149_v27, 1e-24  ;;  %689 = vst.msk [vmem:[%s2473_s2 + $0x4] sm:$0xf] %vm687_vm1, %v1150_v24 }
  0xac   :  { %v531_v8 = vmul.f32 2.0, %v1861_v25  ;;  %v1228_v9 = vpop.eup %1227  ;;  %v1154_v51 = vpack.c.bf16 %v532_v0, %v532_v0  ;;  %v1874_v54 = vmul.f32 %v1226_v42, %v1430_v16 }
  0xad   :  { %1237 = vrsqrt.f32 %v220_v43  ;;  %v1877_v2 = vmul.f32 %v1228_v9, %v1435_v17 }
  0xae   :  { %v1153_v62 = vpack.c.bf16 %v531_v8, %v531_v8  ;;  %1239 = vrsqrt.f32 %v219_v50  ;;  %v158_v63 = vpop.xlane.xlu1 %157  ;;  %v155_v6 = vpop.xlane.xlu0 %154  ;;  %693 = vst.msk [vmem:[%s2473_s2 + $0x14] sm:$0xf] %vm687_vm1, %v1154_v51  ;;  %v534_v10 = vmul.f32 2.0, %v1874_v54 }
  0xaf   :  { %v1230_v24 = vpop.eup %1229  ;;  %v222_v26 = vmax.f32 %v158_v63, 1e-24  ;;  %v221_v27 = vmax.f32 %v155_v6, 1e-24  ;;  %v533_v16 = vmul.f32 2.0, %v1877_v2 }
  0xb0   :  { %692 = vst.msk [vmem:[%s2473_s2 + $0x10] sm:$0xf] %vm687_vm1, %v1153_v62  ;;  %v1232_v17 = vpop.eup %1231  ;;  %v1156_v0 = vpack.c.bf16 %v534_v10, %v534_v10  ;;  %v1890_v42 = vmul.f32 %v1230_v24, %v1446_v22 }
  0xb1   :  { %1241 = vrsqrt.f32 %v222_v26  ;;  %v1155_v43 = vpack.c.bf16 %v533_v16, %v533_v16  ;;  %v1893_v50 = vmul.f32 %v1232_v17, %v1451_v23 }
  0xb2   :  { %1243 = vrsqrt.f32 %v221_v27  ;;  %v164_v8 = vpop.xlane.xlu1 %163  ;;  %v161_v9 = vpop.xlane.xlu0 %160  ;;  %695 = vst.msk [vmem:[%s2473_s2 + $0x1c] sm:$0xf] %vm687_vm1, %v1156_v0  ;;  %v536_v51 = vmul.f32 2.0, %v1890_v42 }
  0xb3   :  { %v1234_v62 = vpop.eup %1233  ;;  %v224_v63 = vmax.f32 %v164_v8, 1e-24  ;;  %v223_v6 = vmax.f32 %v161_v9, 1e-24  ;;  %694 = vst.msk [vmem:[%s2473_s2 + $0x18] sm:$0xf] %vm687_vm1, %v1155_v43 }
  0xb4   :  { %v535_v22 = vmul.f32 2.0, %v1893_v50  ;;  %v1236_v23 = vpop.eup %1235  ;;  %v1158_v10 = vpack.c.bf16 %v536_v51, %v536_v51  ;;  %v1906_v24 = vmul.f32 %v1234_v62, %v1462_v28 }
  0xb5   :  { %1245 = vrsqrt.f32 %v224_v63  ;;  %v1909_v27 = vmul.f32 %v1236_v23, %v1467_v29 }
  0xb6   :  { %v1157_v26 = vpack.c.bf16 %v535_v22, %v535_v22  ;;  %1247 = vrsqrt.f32 %v223_v6  ;;  %v170_v16 = vpop.xlane.xlu1 %169  ;;  %v167_v17 = vpop.xlane.xlu0 %166  ;;  %697 = vst.msk [vmem:[%s2473_s2 + $0x24] sm:$0xf] %vm687_vm1, %v1158_v10  ;;  %v538_v0 = vmul.f32 2.0, %v1906_v24 }
  0xb7   :  { %v1238_v43 = vpop.eup %1237  ;;  %v226_v8 = vmax.f32 %v170_v16, 1e-24  ;;  %v225_v9 = vmax.f32 %v167_v17, 1e-24  ;;  %v537_v28 = vmul.f32 2.0, %v1909_v27 }
  0xb8   :  { %696 = vst.msk [vmem:[%s2473_s2 + $0x20] sm:$0xf] %vm687_vm1, %v1157_v26  ;;  %v1240_v29 = vpop.eup %1239  ;;  %v1160_v51 = vpack.c.bf16 %v538_v0, %v538_v0  ;;  %v1922_v62 = vmul.f32 %v1238_v43, %v1478_v34 }
  0xb9   :  { %1249 = vrsqrt.f32 %v226_v8  ;;  %v1159_v63 = vpack.c.bf16 %v537_v28, %v537_v28  ;;  %v1925_v6 = vmul.f32 %v1240_v29, %v1483_v35 }
  0xba   :  { %1251 = vrsqrt.f32 %v225_v9  ;;  %v176_v22 = vpop.xlane.xlu1 %175  ;;  %v173_v23 = vpop.xlane.xlu0 %172  ;;  %699 = vst.msk [vmem:[%s2473_s2 + $0x2c] sm:$0xf] %vm687_vm1, %v1160_v51  ;;  %v540_v10 = vmul.f32 2.0, %v1922_v62 }
  0xbb   :  { %v1242_v26 = vpop.eup %1241  ;;  %v228_v16 = vmax.f32 %v176_v22, 1e-24  ;;  %v227_v17 = vmax.f32 %v173_v23, 1e-24  ;;  %698 = vst.msk [vmem:[%s2473_s2 + $0x28] sm:$0xf] %vm687_vm1, %v1159_v63 }
  0xbc   :  { %v539_v34 = vmul.f32 2.0, %v1925_v6  ;;  %v1244_v35 = vpop.eup %1243  ;;  %v1162_v0 = vpack.c.bf16 %v540_v10, %v540_v10  ;;  %v1938_v43 = vmul.f32 %v1242_v26, %v1494_v40 }
  0xbd   :  { %1253 = vrsqrt.f32 %v228_v16  ;;  %v1941_v9 = vmul.f32 %v1244_v35, %v1499_v41 }
  0xbe   :  { %v1161_v8 = vpack.c.bf16 %v539_v34, %v539_v34  ;;  %1255 = vrsqrt.f32 %v227_v17  ;;  %v182_v28 = vpop.xlane.xlu1 %181  ;;  %v179_v29 = vpop.xlane.xlu0 %178  ;;  %701 = vst.msk [vmem:[%s2473_s2 + $0x34] sm:$0xf] %vm687_vm1, %v1162_v0  ;;  %v542_v51 = vmul.f32 2.0, %v1938_v43 }
  0xbf   :  { %v1246_v63 = vpop.eup %1245  ;;  %v230_v22 = vmax.f32 %v182_v28, 1e-24  ;;  %v229_v23 = vmax.f32 %v179_v29, 1e-24  ;;  %v541_v40 = vmul.f32 2.0, %v1941_v9 }
  0xc0   :  { %700 = vst.msk [vmem:[%s2473_s2 + $0x30] sm:$0xf] %vm687_vm1, %v1161_v8  ;;  %v1248_v41 = vpop.eup %1247  ;;  %v1164_v10 = vpack.c.bf16 %v542_v51, %v542_v51  ;;  %v1954_v26 = vmul.f32 %v1246_v63, %v1510_v46 }
  0xc1   :  { %1257 = vrsqrt.f32 %v230_v22  ;;  %v1163_v16 = vpack.c.bf16 %v541_v40, %v541_v40  ;;  %v1957_v17 = vmul.f32 %v1248_v41, %v1515_v47 }
  0xc2   :  { %1259 = vrsqrt.f32 %v229_v23  ;;  %v188_v34 = vpop.xlane.xlu1 %187  ;;  %v185_v35 = vpop.xlane.xlu0 %184  ;;  %703 = vst.msk [vmem:[%s2473_s2 + $0x3c] sm:$0xf] %vm687_vm1, %v1164_v10  ;;  %v544_v0 = vmul.f32 2.0, %v1954_v26 }
  0xc3   :  { %v1250_v8 = vpop.eup %1249  ;;  %v232_v28 = vmax.f32 %v188_v34, 1e-24  ;;  %v231_v29 = vmax.f32 %v185_v35, 1e-24  ;;  %702 = vst.msk [vmem:[%s2473_s2 + $0x38] sm:$0xf] %vm687_vm1, %v1163_v16 }
  0xc4   :  { %v543_v46 = vmul.f32 2.0, %v1957_v17  ;;  %v1252_v47 = vpop.eup %1251  ;;  %v1166_v51 = vpack.c.bf16 %v544_v0, %v544_v0  ;;  %v1970_v63 = vmul.f32 %v1250_v8, %v1526_v52 }
  0xc5   :  { %1261 = vrsqrt.f32 %v232_v28  ;;  %v1973_v23 = vmul.f32 %v1252_v47, %v1531_v53 }
  0xc6   :  { %v1165_v22 = vpack.c.bf16 %v543_v46, %v543_v46  ;;  %1263 = vrsqrt.f32 %v231_v29  ;;  %v194_v40 = vpop.xlane.xlu1 %193  ;;  %v191_v41 = vpop.xlane.xlu0 %190  ;;  %705 = vst.msk [vmem:[%s2473_s2 + $0x44] sm:$0xf] %vm687_vm1, %v1166_v51  ;;  %v546_v10 = vmul.f32 2.0, %v1970_v63 }
  0xc7   :  { %v1254_v16 = vpop.eup %1253  ;;  %v234_v34 = vmax.f32 %v194_v40, 1e-24  ;;  %v233_v35 = vmax.f32 %v191_v41, 1e-24  ;;  %v545_v52 = vmul.f32 2.0, %v1973_v23 }
  0xc8   :  { %704 = vst.msk [vmem:[%s2473_s2 + $0x40] sm:$0xf] %vm687_vm1, %v1165_v22  ;;  %v1256_v53 = vpop.eup %1255  ;;  %v1168_v0 = vpack.c.bf16 %v546_v10, %v546_v10  ;;  %v1986_v8 = vmul.f32 %v1254_v16, %v1542_v58 }
  0xc9   :  { %1265 = vrsqrt.f32 %v234_v34  ;;  %v1167_v28 = vpack.c.bf16 %v545_v52, %v545_v52  ;;  %v1989_v29 = vmul.f32 %v1256_v53, %v1547_v59 }
  0xca   :  { %1267 = vrsqrt.f32 %v233_v35  ;;  %v200_v46 = vpop.xlane.xlu1 %199  ;;  %v197_v47 = vpop.xlane.xlu0 %196  ;;  %707 = vst.msk [vmem:[%s2473_s2 + $0x4c] sm:$0xf] %vm687_vm1, %v1168_v0  ;;  %v548_v51 = vmul.f32 2.0, %v1986_v8 }
  0xcb   :  { %v1258_v22 = vpop.eup %1257  ;;  %v236_v40 = vmax.f32 %v200_v46, 1e-24  ;;  %v235_v41 = vmax.f32 %v197_v47, 1e-24  ;;  %706 = vst.msk [vmem:[%s2473_s2 + $0x48] sm:$0xf] %vm687_vm1, %v1167_v28 }
  0xcc   :  { %v547_v58 = vmul.f32 2.0, %v1989_v29  ;;  %v1260_v59 = vpop.eup %1259  ;;  %v1170_v10 = vpack.c.bf16 %v548_v51, %v548_v51  ;;  %v2002_v16 = vmul.f32 %v1258_v22, %v1558_v3 }
  0xcd   :  { %1269 = vrsqrt.f32 %v236_v40  ;;  %v2005_v35 = vmul.f32 %v1260_v59, %v1563_v4 }
  0xce   :  { %v1169_v34 = vpack.c.bf16 %v547_v58, %v547_v58  ;;  %1271 = vrsqrt.f32 %v235_v41  ;;  %v206_v52 = vpop.xlane.xlu1 %205  ;;  %v203_v53 = vpop.xlane.xlu0 %202  ;;  %709 = vst.msk [vmem:[%s2473_s2 + $0x54] sm:$0xf] %vm687_vm1, %v1170_v10  ;;  %v550_v0 = vmul.f32 2.0, %v2002_v16 }
  0xcf   :  { %v1262_v28 = vpop.eup %1261  ;;  %v238_v46 = vmax.f32 %v206_v52, 1e-24  ;;  %v237_v47 = vmax.f32 %v203_v53, 1e-24  ;;  %v549_v3 = vmul.f32 2.0, %v2005_v35 }
  0xd0   :  { %708 = vst.msk [vmem:[%s2473_s2 + $0x50] sm:$0xf] %vm687_vm1, %v1169_v34  ;;  %v1264_v4 = vpop.eup %1263  ;;  %v1172_v51 = vpack.c.bf16 %v550_v0, %v550_v0  ;;  %v2018_v22 = vmul.f32 %v1262_v28, %v1574_v12 }
  0xd1   :  { %1273 = vrsqrt.f32 %v238_v46  ;;  %v1171_v40 = vpack.c.bf16 %v549_v3, %v549_v3  ;;  %v2021_v41 = vmul.f32 %v1264_v4, %v1579_v13 }
  0xd2   :  { %1275 = vrsqrt.f32 %v237_v47  ;;  %v340_v58 = vpop.xlane.xlu1 %339  ;;  %v337_v59 = vpop.xlane.xlu0 %336  ;;  %711 = vst.msk [vmem:[%s2473_s2 + $0x5c] sm:$0xf] %vm687_vm1, %v1172_v51  ;;  %v552_v10 = vmul.f32 2.0, %v2018_v22 }
  0xd3   :  { %v1266_v34 = vpop.eup %1265  ;;  %v432_v52 = vmax.f32 %v340_v58, 1e-24  ;;  %v431_v53 = vmax.f32 %v337_v59, 1e-24  ;;  %710 = vst.msk [vmem:[%s2473_s2 + $0x58] sm:$0xf] %vm687_vm1, %v1171_v40 }
  0xd4   :  { %v551_v12 = vmul.f32 2.0, %v2021_v41  ;;  %v1268_v13 = vpop.eup %1267  ;;  %v1174_v0 = vpack.c.bf16 %v552_v10, %v552_v10  ;;  %v2034_v28 = vmul.f32 %v1266_v34, %v1590_v20 }
  0xd5   :  { %1277 = vrsqrt.f32 %v432_v52  ;;  %v2037_v47 = vmul.f32 %v1268_v13, %v1595_v21 }
  0xd6   :  { %v1173_v46 = vpack.c.bf16 %v551_v12, %v551_v12  ;;  %1279 = vrsqrt.f32 %v431_v53  ;;  %v346_v3 = vpop.xlane.xlu1 %345  ;;  %v343_v4 = vpop.xlane.xlu0 %342  ;;  %713 = vst.msk [vmem:[%s2473_s2 + $0x64] sm:$0xf] %vm687_vm1, %v1174_v0  ;;  %v554_v51 = vmul.f32 2.0, %v2034_v28 }
  0xd7   :  { %v1270_v40 = vpop.eup %1269  ;;  %v434_v58 = vmax.f32 %v346_v3, 1e-24  ;;  %v433_v59 = vmax.f32 %v343_v4, 1e-24  ;;  %v553_v20 = vmul.f32 2.0, %v2037_v47 }
  0xd8   :  { %712 = vst.msk [vmem:[%s2473_s2 + $0x60] sm:$0xf] %vm687_vm1, %v1173_v46  ;;  %v1272_v21 = vpop.eup %1271  ;;  %v1176_v10 = vpack.c.bf16 %v554_v51, %v554_v51  ;;  %v2050_v34 = vmul.f32 %v1270_v40, %v1606_v30 }
  0xd9   :  { %1281 = vrsqrt.f32 %v434_v58  ;;  %v1175_v52 = vpack.c.bf16 %v553_v20, %v553_v20  ;;  %v2053_v53 = vmul.f32 %v1272_v21, %v1611_v31 }
  0xda   :  { %1283 = vrsqrt.f32 %v433_v59  ;;  %v352_v12 = vpop.xlane.xlu1 %351  ;;  %v349_v13 = vpop.xlane.xlu0 %348  ;;  %715 = vst.msk [vmem:[%s2473_s2 + $0x6c] sm:$0xf] %vm687_vm1, %v1176_v10  ;;  %v556_v0 = vmul.f32 2.0, %v2050_v34 }
  0xdb   :  { %v1274_v46 = vpop.eup %1273  ;;  %v436_v3 = vmax.f32 %v352_v12, 1e-24  ;;  %v435_v4 = vmax.f32 %v349_v13, 1e-24  ;;  %714 = vst.msk [vmem:[%s2473_s2 + $0x68] sm:$0xf] %vm687_vm1, %v1175_v52 }
  0xdc   :  { %v555_v30 = vmul.f32 2.0, %v2053_v53  ;;  %v1276_v31 = vpop.eup %1275  ;;  %v1178_v51 = vpack.c.bf16 %v556_v0, %v556_v0  ;;  %v2066_v40 = vmul.f32 %v1274_v46, %v1622_v38 }
  0xdd   :  { %1285 = vrsqrt.f32 %v436_v3  ;;  %v2069_v59 = vmul.f32 %v1276_v31, %v1627_v39 }
  0xde   :  { %v1177_v58 = vpack.c.bf16 %v555_v30, %v555_v30  ;;  %1287 = vrsqrt.f32 %v435_v4  ;;  %v358_v20 = vpop.xlane.xlu1 %357  ;;  %v355_v21 = vpop.xlane.xlu0 %354  ;;  %717 = vst.msk [vmem:[%s2473_s2 + $0x74] sm:$0xf] %vm687_vm1, %v1178_v51  ;;  %v558_v10 = vmul.f32 2.0, %v2066_v40 }
  0xdf   :  { %2479 = vst [vmem:[#allocation3_spill] sm:$0xff] %v2069_v59  ;;  %v1278_v52 = vpop.eup %1277  ;;  %v438_v12 = vmax.f32 %v358_v20, 1e-24  ;;  %v437_v13 = vmax.f32 %v355_v21, 1e-24  ;;  %v557_v38 = vmul.f32 2.0, %v2069_v59 }
  0xe0   :  { %716 = vst.msk [vmem:[%s2473_s2 + $0x70] sm:$0xf] %vm687_vm1, %v1177_v58  ;;  %v1280_v39 = vpop.eup %1279  ;;  %v496_v0 = vmul.f32 %v1278_v52, %v1638_v48  ;;  %v1180_v46 = vpack.c.bf16 %v558_v10, %v558_v10 }
  0xe1   :  { %1289 = vrsqrt.f32 %v438_v12  ;;  %v495_v3 = vmul.f32 %v1280_v39, %v1643_v49  ;;  %v1179_v4 = vpack.c.bf16 %v557_v38, %v557_v38 }
  0xe2   :  { %1291 = vrsqrt.f32 %v437_v13  ;;  %v364_v30 = vpop.xlane.xlu1 %363  ;;  %v361_v31 = vpop.xlane.xlu0 %360  ;;  %v1182_v51 = vpack.c.bf16 %v496_v0, %v496_v0  ;;  %v881_v20 = vmul.f32 %v496_v0, %v1845_v1  ;;  %719 = vst.msk [vmem:[%s2473_s2 + $0x7c] sm:$0xf] %vm687_vm1, %v1180_v46 }
  0xe3   :  { %v1282_v58 = vpop.eup %1281  ;;  %v440_v21 = vmax.f32 %v364_v30, 1e-24  ;;  %v439_v59 = vmax.f32 %v361_v31, 1e-24  ;;  %v880_v48 = vmul.f32 %v495_v3, %v1837_v55  ;;  %v1181_v10 = vpack.c.bf16 %v495_v3, %v495_v3  ;;  %718 = vst.msk [vmem:[%s2473_s2 + $0x78] sm:$0xf] %vm687_vm1, %v1179_v4 }
  0xe4   :  { %v1284_v49 = vpop.eup %1283  ;;  %849 = vst.msk [vmem:[%s2474_s3 + $0x4] sm:$0xf] %vm687_vm1, %v1182_v51  ;;  %v915_v1 = vsel %vm110_vm0, %v881_v20, 0.0  ;;  %v498_v52 = vmul.f32 %v1282_v58, %v1654_v56 }
  0xe5   :  { %1293 = vrsqrt.f32 %v440_v21  ;;  %916 = vadd.xlane.f32.xlu1 %v915_v1  ;;  %v912_v55 = vsel %vm110_vm0, %v880_v48, 0.0  ;;  %848 = vst.msk [vmem:[%s2474_s3] sm:$0xf] %vm687_vm1, %v1181_v10  ;;  %v497_v12 = vmul.f32 %v1284_v49, %v1659_v57 }
  0xe6   :  { %1295 = vrsqrt.f32 %v439_v59  ;;  %913 = vadd.xlane.f32.xlu0 %v912_v55  ;;  %v370_v13 = vpop.xlane.xlu1 %369  ;;  %v367_v38 = vpop.xlane.xlu0 %366  ;;  %v1184_v39 = vpack.c.bf16 %v498_v52, %v498_v52  ;;  %v883_v0 = vmul.f32 %v498_v52, %v1842_v37 }
  0xe7   :  { %v1286_v46 = vpop.eup %1285  ;;  %v442_v56 = vmax.f32 %v370_v13, 1e-24  ;;  %v441_v3 = vmax.f32 %v367_v38, 1e-24  ;;  %v882_v4 = vmul.f32 %v497_v12, %v1834_v36  ;;  %v1183_v30 = vpack.c.bf16 %v497_v12, %v497_v12 }
  0xe8   :  { %v1288_v31 = vpop.eup %1287  ;;  %851 = vst.msk [vmem:[%s2474_s3 + $0xc] sm:$0xf] %vm687_vm1, %v1184_v39  ;;  %v921_v57 = vsel %vm110_vm0, %v883_v0, 0.0  ;;  %v500_v59 = vmul.f32 %v1286_v46, %v1670_v5 }
  0xe9   :  { %1297 = vrsqrt.f32 %v442_v56  ;;  %922 = vadd.xlane.f32.xlu1 %v921_v57  ;;  %v918_v37 = vsel %vm110_vm0, %v882_v4, 0.0  ;;  %850 = vst.msk [vmem:[%s2474_s3 + $0x8] sm:$0xf] %vm687_vm1, %v1183_v30  ;;  %v499_v36 = vmul.f32 %v1288_v31, %v1675_v7 }
  0xea   :  { %1299 = vrsqrt.f32 %v441_v3  ;;  %919 = vadd.xlane.f32.xlu0 %v918_v37  ;;  %v376_v51 = vpop.xlane.xlu1 %375  ;;  %v373_v20 = vpop.xlane.xlu0 %372  ;;  %v1186_v58 = vpack.c.bf16 %v500_v59, %v500_v59  ;;  %v885_v21 = vmul.f32 %v500_v59, %v1858_v11 }
  0xeb   :  { %v1290_v48 = vpop.eup %1289  ;;  %v444_v5 = vmax.f32 %v376_v51, 1e-24  ;;  %v443_v10 = vmax.f32 %v373_v20, 1e-24  ;;  %v884_v49 = vmul.f32 %v499_v36, %v1861_v25  ;;  %v1185_v1 = vpack.c.bf16 %v499_v36, %v499_v36 }
  0xec   :  { %v1292_v52 = vpop.eup %1291  ;;  %853 = vst.msk [vmem:[%s2474_s3 + $0x14] sm:$0xf] %vm687_vm1, %v1186_v58  ;;  %v927_v7 = vsel %vm110_vm0, %v885_v21, 0.0  ;;  %v502_v55 = vmul.f32 %v1290_v48, %v1686_v18 }
  0xed   :  { %1301 = vrsqrt.f32 %v444_v5  ;;  %928 = vadd.xlane.f32.xlu1 %v927_v7  ;;  %v924_v11 = vsel %vm110_vm0, %v884_v49, 0.0  ;;  %852 = vst.msk [vmem:[%s2474_s3 + $0x10] sm:$0xf] %vm687_vm1, %v1185_v1  ;;  %v501_v25 = vmul.f32 %v1292_v52, %v1691_v19 }
  0xee   :  { %1303 = vrsqrt.f32 %v443_v10  ;;  %925 = vadd.xlane.f32.xlu0 %v924_v11  ;;  %v382_v12 = vpop.xlane.xlu1 %381  ;;  %v379_v13 = vpop.xlane.xlu0 %378  ;;  %v1188_v38 = vpack.c.bf16 %v502_v55, %v502_v55  ;;  %v887_v39 = vmul.f32 %v502_v55, %v1874_v54 }
  0xef   :  { %v1294_v0 = vpop.eup %1293  ;;  %v446_v18 = vmax.f32 %v382_v12, 1e-24  ;;  %v445_v46 = vmax.f32 %v379_v13, 1e-24  ;;  %v886_v56 = vmul.f32 %v501_v25, %v1877_v2  ;;  %v1187_v3 = vpack.c.bf16 %v501_v25, %v501_v25 }
  0xf0   :  { %v1296_v4 = vpop.eup %1295  ;;  %855 = vst.msk [vmem:[%s2474_s3 + $0x1c] sm:$0xf] %vm687_vm1, %v1188_v38  ;;  %v933_v19 = vsel %vm110_vm0, %v887_v39, 0.0  ;;  %v504_v30 = vmul.f32 %v1294_v0, %v1702_v32 }
  0xf1   :  { %1305 = vrsqrt.f32 %v446_v18  ;;  %934 = vadd.xlane.f32.xlu1 %v933_v19  ;;  %v930_v54 = vsel %vm110_vm0, %v886_v56, 0.0  ;;  %854 = vst.msk [vmem:[%s2474_s3 + $0x18] sm:$0xf] %vm687_vm1, %v1187_v3  ;;  %v503_v2 = vmul.f32 %v1296_v4, %v1707_v33 }
  0xf2   :  { %1307 = vrsqrt.f32 %v445_v46  ;;  %931 = vadd.xlane.f32.xlu0 %v930_v54  ;;  %v388_v31 = vpop.xlane.xlu1 %387  ;;  %v385_v57 = vpop.xlane.xlu0 %384  ;;  %v1190_v59 = vpack.c.bf16 %v504_v30, %v504_v30  ;;  %v889_v37 = vmul.f32 %v504_v30, %v1890_v42 }
  0xf3   :  { %v1298_v36 = vpop.eup %1297  ;;  %v448_v32 = vmax.f32 %v388_v31, 1e-24  ;;  %v447_v51 = vmax.f32 %v385_v57, 1e-24  ;;  %v888_v20 = vmul.f32 %v503_v2, %v1893_v50  ;;  %v1189_v58 = vpack.c.bf16 %v503_v2, %v503_v2 }
  0xf4   :  { %v1300_v21 = vpop.eup %1299  ;;  %857 = vst.msk [vmem:[%s2474_s3 + $0x24] sm:$0xf] %vm687_vm1, %v1190_v59  ;;  %v939_v33 = vsel %vm110_vm0, %v889_v37, 0.0  ;;  %v506_v48 = vmul.f32 %v1298_v36, %v1718_v44 }
  0xf5   :  { %1309 = vrsqrt.f32 %v448_v32  ;;  %940 = vadd.xlane.f32.xlu1 %v939_v33  ;;  %v936_v42 = vsel %vm110_vm0, %v888_v20, 0.0  ;;  %856 = vst.msk [vmem:[%s2474_s3 + $0x20] sm:$0xf] %vm687_vm1, %v1189_v58  ;;  %v505_v50 = vmul.f32 %v1300_v21, %v1723_v45 }
  0xf6   :  { %1311 = vrsqrt.f32 %v447_v51  ;;  %937 = vadd.xlane.f32.xlu0 %v936_v42  ;;  %v394_v5 = vpop.xlane.xlu1 %393  ;;  %v391_v10 = vpop.xlane.xlu0 %390  ;;  %v1192_v49 = vpack.c.bf16 %v506_v48, %v506_v48  ;;  %v891_v1 = vmul.f32 %v506_v48, %v1906_v24  ;;  %v2480_v51 = vld [vmem:[#allocation2_spill] sm:$0xff] }
  0xf7   :  { %v1302_v52 = vpop.eup %1301  ;;  %v450_v44 = vmax.f32 %v394_v5, 1e-24  ;;  %v449_v7 = vmax.f32 %v391_v10, 1e-24  ;;  %v890_v55 = vmul.f32 %v505_v50, %v1909_v27  ;;  %v1191_v11 = vpack.c.bf16 %v505_v50, %v505_v50 }
  0xf8   :  { %v1304_v25 = vpop.eup %1303  ;;  %859 = vst.msk [vmem:[%s2474_s3 + $0x2c] sm:$0xf] %vm687_vm1, %v1192_v49  ;;  %v945_v45 = vsel %vm110_vm0, %v891_v1, 0.0  ;;  %v508_v12 = vmul.f32 %v1302_v52, %v1734_v60 }
  0xf9   :  { %1313 = vrsqrt.f32 %v450_v44  ;;  %946 = vadd.xlane.f32.xlu1 %v945_v45  ;;  %v942_v24 = vsel %vm110_vm0, %v890_v55, 0.0  ;;  %858 = vst.msk [vmem:[%s2474_s3 + $0x28] sm:$0xf] %vm687_vm1, %v1191_v11  ;;  %v507_v27 = vmul.f32 %v1304_v25, %v1739_v61 }
  0xfa   :  { %1315 = vrsqrt.f32 %v449_v7  ;;  %943 = vadd.xlane.f32.xlu0 %v942_v24  ;;  %v400_v13 = vpop.xlane.xlu1 %399  ;;  %v397_v38 = vpop.xlane.xlu0 %396  ;;  %v1194_v39 = vpack.c.bf16 %v508_v12, %v508_v12  ;;  %v893_v0 = vmul.f32 %v508_v12, %v1922_v62  ;;  %v1342_v7 = vld [vmem:[%s2472_s1 + $0x98] sm:$0xff] }
  0xfb   :  { %v1306_v18 = vpop.eup %1305  ;;  %v452_v60 = vmax.f32 %v400_v13, 1e-24  ;;  %v451_v46 = vmax.f32 %v397_v38, 1e-24  ;;  %v892_v56 = vmul.f32 %v507_v27, %v1925_v6  ;;  %v1193_v3 = vpack.c.bf16 %v507_v27, %v507_v27 }
  0xfc   :  { %v1308_v4 = vpop.eup %1307  ;;  %861 = vst.msk [vmem:[%s2474_s3 + $0x34] sm:$0xf] %vm687_vm1, %v1194_v39  ;;  %v951_v61 = vsel %vm110_vm0, %v893_v0, 0.0  ;;  %v510_v19 = vmul.f32 %v1306_v18, %v1750_v14 }
  0xfd   :  { %1317 = vrsqrt.f32 %v452_v60  ;;  %952 = vadd.xlane.f32.xlu1 %v951_v61  ;;  %v948_v62 = vsel %vm110_vm0, %v892_v56, 0.0  ;;  %860 = vst.msk [vmem:[%s2474_s3 + $0x30] sm:$0xf] %vm687_vm1, %v1193_v3  ;;  %v509_v6 = vmul.f32 %v1308_v4, %v1755_v15 }
  0xfe   :  { %1319 = vrsqrt.f32 %v451_v46  ;;  %949 = vadd.xlane.f32.xlu0 %v948_v62  ;;  %v406_v30 = vpop.xlane.xlu1 %405  ;;  %v403_v54 = vpop.xlane.xlu0 %402  ;;  %v1196_v2 = vpack.c.bf16 %v510_v19, %v510_v19  ;;  %v895_v31 = vmul.f32 %v510_v19, %v1938_v43  ;;  %v1344_v46 = vld [vmem:[%s2472_s1 + $0xa8] sm:$0xff] }
  0xff   :  { %v1310_v57 = vpop.eup %1309  ;;  %v454_v14 = vmax.f32 %v406_v30, 1e-24  ;;  %v453_v59 = vmax.f32 %v403_v54, 1e-24  ;;  %v894_v37 = vmul.f32 %v509_v6, %v1941_v9  ;;  %v1195_v36 = vpack.c.bf16 %v509_v6, %v509_v6  ;;  %v1341_v9 = vld [vmem:[%s2472_s1 + $0x80] sm:$0xff] }
 0x100   :  { %v1312_v32 = vpop.eup %1311  ;;  %863 = vst.msk [vmem:[%s2474_s3 + $0x3c] sm:$0xf] %vm687_vm1, %v1196_v2  ;;  %v957_v15 = vsel %vm110_vm0, %v895_v31, 0.0  ;;  %v512_v20 = vmul.f32 %v1310_v57, %v2480_v51 }
 0x101   :  { %1321 = vrsqrt.f32 %v454_v14  ;;  %958 = vadd.xlane.f32.xlu1 %v957_v15  ;;  %v954_v43 = vsel %vm110_vm0, %v894_v37, 0.0  ;;  %862 = vst.msk [vmem:[%s2474_s3 + $0x38] sm:$0xf] %vm687_vm1, %v1195_v36  ;;  %v511_v58 = vmul.f32 %v1341_v9, %v1312_v32 }
 0x102   :  { %1323 = vrsqrt.f32 %v453_v59  ;;  %955 = vadd.xlane.f32.xlu0 %v954_v43  ;;  %v412_v21 = vpop.xlane.xlu1 %411  ;;  %v409_v33 = vpop.xlane.xlu0 %408  ;;  %v1198_v48 = vpack.c.bf16 %v512_v20, %v512_v20  ;;  %v897_v42 = vmul.f32 %v512_v20, %v1954_v26  ;;  %v1346_v59 = vld [vmem:[%s2472_s1 + $0xb8] sm:$0xff] }
 0x103   :  { %v1314_v50 = vpop.eup %1313  ;;  %v456_v5 = vmax.f32 %v412_v21, 1e-24  ;;  %v455_v10 = vmax.f32 %v409_v33, 1e-24  ;;  %v896_v49 = vmul.f32 %v511_v58, %v1957_v17  ;;  %v1197_v1 = vpack.c.bf16 %v511_v58, %v511_v58  ;;  %v1343_v17 = vld [vmem:[%s2472_s1 + $0x90] sm:$0xff] }
 0x104   :  { %v1316_v52 = vpop.eup %1315  ;;  %865 = vst.msk [vmem:[%s2474_s3 + $0x44] sm:$0xf] %vm687_vm1, %v1198_v48  ;;  %v963_v44 = vsel %vm110_vm0, %v897_v42, 0.0  ;;  %v514_v55 = vmul.f32 %v1342_v7, %v1314_v50  ;;  %v1348_v50 = vld [vmem:[%s2472_s1 + $0xc8] sm:$0xff] }
 0x105   :  { %1325 = vrsqrt.f32 %v456_v5  ;;  %964 = vadd.xlane.f32.xlu1 %v963_v44  ;;  %v960_v26 = vsel %vm110_vm0, %v896_v49, 0.0  ;;  %864 = vst.msk [vmem:[%s2474_s3 + $0x40] sm:$0xf] %vm687_vm1, %v1197_v1  ;;  %v513_v11 = vmul.f32 %v1343_v17, %v1316_v52  ;;  %v1350_v17 = vld [vmem:[%s2472_s1 + $0xd8] sm:$0xff] }
 0x106   :  { %1327 = vrsqrt.f32 %v455_v10  ;;  %961 = vadd.xlane.f32.xlu0 %v960_v26  ;;  %v418_v25 = vpop.xlane.xlu1 %417  ;;  %v415_v45 = vpop.xlane.xlu0 %414  ;;  %v1200_v12 = vpack.c.bf16 %v514_v55, %v514_v55  ;;  %v899_v24 = vmul.f32 %v514_v55, %v1970_v63 }
 0x107   :  { %v1318_v27 = vpop.eup %1317  ;;  %v458_v13 = vmax.f32 %v418_v25, 1e-24  ;;  %v457_v38 = vmax.f32 %v415_v45, 1e-24  ;;  %v898_v39 = vmul.f32 %v513_v11, %v1973_v23  ;;  %v1199_v0 = vpack.c.bf16 %v513_v11, %v513_v11  ;;  %v1345_v23 = vld [vmem:[%s2472_s1 + $0xa0] sm:$0xff] }
 0x108   :  { %v1320_v18 = vpop.eup %1319  ;;  %867 = vst.msk [vmem:[%s2474_s3 + $0x4c] sm:$0xf] %vm687_vm1, %v1200_v12  ;;  %v969_v60 = vsel %vm110_vm0, %v899_v24, 0.0  ;;  %v516_v56 = vmul.f32 %v1344_v46, %v1318_v27 }
 0x109   :  { %1329 = vrsqrt.f32 %v458_v13  ;;  %970 = vadd.xlane.f32.xlu1 %v969_v60  ;;  %v966_v63 = vsel %vm110_vm0, %v898_v39, 0.0  ;;  %866 = vst.msk [vmem:[%s2474_s3 + $0x48] sm:$0xf] %vm687_vm1, %v1199_v0  ;;  %v515_v3 = vmul.f32 %v1345_v23, %v1320_v18  ;;  %v1352_v0 = vld [vmem:[%s2472_s1 + $0xe8] sm:$0xff] }
 0x10a   :  { %1331 = vrsqrt.f32 %v457_v38  ;;  %967 = vadd.xlane.f32.xlu0 %v966_v63  ;;  %v424_v4 = vpop.xlane.xlu1 %423  ;;  %v421_v61 = vpop.xlane.xlu0 %420  ;;  %v1202_v19 = vpack.c.bf16 %v516_v56, %v516_v56  ;;  %v901_v62 = vmul.f32 %v516_v56, %v1986_v8 }
 0x10b   :  { %v1322_v6 = vpop.eup %1321  ;;  %v460_v30 = vmax.f32 %v424_v4, 1e-24  ;;  %v459_v54 = vmax.f32 %v421_v61, 1e-24  ;;  %v900_v2 = vmul.f32 %v515_v3, %v1989_v29  ;;  %v1201_v31 = vpack.c.bf16 %v515_v3, %v515_v3  ;;  %v1347_v29 = vld [vmem:[%s2472_s1 + $0xb0] sm:$0xff] }
 0x10c   :  { %v1324_v57 = vpop.eup %1323  ;;  %869 = vst.msk [vmem:[%s2474_s3 + $0x54] sm:$0xf] %vm687_vm1, %v1202_v19  ;;  %v975_v14 = vsel %vm110_vm0, %v901_v62, 0.0  ;;  %v518_v37 = vmul.f32 %v1346_v59, %v1322_v6  ;;  %v1354_v19 = vld [vmem:[%s2472_s1 + $0xf8] sm:$0xff] }
 0x10d   :  { %1333 = vrsqrt.f32 %v460_v30  ;;  %976 = vadd.xlane.f32.xlu1 %v975_v14  ;;  %v972_v8 = vsel %vm110_vm0, %v900_v2, 0.0  ;;  %868 = vst.msk [vmem:[%s2474_s3 + $0x50] sm:$0xf] %vm687_vm1, %v1201_v31  ;;  %v517_v36 = vmul.f32 %v1347_v29, %v1324_v57  ;;  %v2481_v2 = vld [vmem:[#allocation3_spill] sm:$0xff] }
 0x10e   :  { %1335 = vrsqrt.f32 %v459_v54  ;;  %973 = vadd.xlane.f32.xlu0 %v972_v8  ;;  %v430_v32 = vpop.xlane.xlu1 %429  ;;  %v427_v15 = vpop.xlane.xlu0 %426  ;;  %v1204_v51 = vpack.c.bf16 %v518_v37, %v518_v37  ;;  %v903_v20 = vmul.f32 %v518_v37, %v2002_v16 }
 0x10f   :  { %v1326_v43 = vpop.eup %1325  ;;  %v462_v9 = vmax.f32 %v430_v32, 1e-24  ;;  %v461_v58 = vmax.f32 %v427_v15, 1e-24  ;;  %v902_v21 = vmul.f32 %v517_v36, %v2005_v35  ;;  %v1203_v33 = vpack.c.bf16 %v517_v36, %v517_v36  ;;  %v1349_v35 = vld [vmem:[%s2472_s1 + $0xc0] sm:$0xff] }
 0x110   :  { %v1328_v48 = vpop.eup %1327  ;;  %871 = vst.msk [vmem:[%s2474_s3 + $0x5c] sm:$0xf] %vm687_vm1, %v1204_v51  ;;  %v981_v42 = vsel %vm110_vm0, %v903_v20, 0.0  ;;  %v520_v5 = vmul.f32 %v1348_v50, %v1326_v43 }
 0x111   :  { %1337 = vrsqrt.f32 %v462_v9  ;;  %982 = vadd.xlane.f32.xlu1 %v981_v42  ;;  %v978_v16 = vsel %vm110_vm0, %v902_v21, 0.0  ;;  %870 = vst.msk [vmem:[%s2474_s3 + $0x58] sm:$0xf] %vm687_vm1, %v1203_v33  ;;  %v519_v10 = vmul.f32 %v1349_v35, %v1328_v48 }
 0x112   :  { %1339 = vrsqrt.f32 %v461_v58  ;;  %979 = vadd.xlane.f32.xlu0 %v978_v16  ;;  %v1206_v49 = vpack.c.bf16 %v520_v5, %v520_v5  ;;  %v905_v1 = vmul.f32 %v520_v5, %v2018_v22 }
 0x113   :  { %v1330_v52 = vpop.eup %1329  ;;  %v904_v44 = vmul.f32 %v519_v10, %v2021_v41  ;;  %v1205_v7 = vpack.c.bf16 %v519_v10, %v519_v10  ;;  %v1351_v41 = vld [vmem:[%s2472_s1 + $0xd0] sm:$0xff] }
 0x114   :  { %v1332_v55 = vpop.eup %1331  ;;  %873 = vst.msk [vmem:[%s2474_s3 + $0x64] sm:$0xf] %vm687_vm1, %v1206_v49  ;;  %v987_v26 = vsel %vm110_vm0, %v905_v1, 0.0  ;;  %v522_v11 = vmul.f32 %v1350_v17, %v1330_v52 }
 0x115   :  { %988 = vadd.xlane.f32.xlu1 %v987_v26  ;;  %v984_v22 = vsel %vm110_vm0, %v904_v44, 0.0  ;;  %872 = vst.msk [vmem:[%s2474_s3 + $0x60] sm:$0xf] %vm687_vm1, %v1205_v7  ;;  %v521_v25 = vmul.f32 %v1351_v41, %v1332_v55 }
 0x116   :  { %985 = vadd.xlane.f32.xlu0 %v984_v22  ;;  %v1208_v45 = vpack.c.bf16 %v522_v11, %v522_v11  ;;  %v907_v12 = vmul.f32 %v522_v11, %v2034_v28 }
 0x117   :  { %v1334_v24 = vpop.eup %1333  ;;  %v906_v27 = vmul.f32 %v521_v25, %v2037_v47  ;;  %v1207_v13 = vpack.c.bf16 %v521_v25, %v521_v25  ;;  %v1353_v47 = vld [vmem:[%s2472_s1 + $0xe0] sm:$0xff] }
 0x118   :  { %v1336_v38 = vpop.eup %1335  ;;  %875 = vst.msk [vmem:[%s2474_s3 + $0x6c] sm:$0xf] %vm687_vm1, %v1208_v45  ;;  %v993_v39 = vsel %vm110_vm0, %v907_v12, 0.0  ;;  %v524_v18 = vmul.f32 %v1352_v0, %v1334_v24 }
 0x119   :  { %994 = vadd.xlane.f32.xlu1 %v993_v39  ;;  %v990_v28 = vsel %vm110_vm0, %v906_v27, 0.0  ;;  %874 = vst.msk [vmem:[%s2474_s3 + $0x68] sm:$0xf] %vm687_vm1, %v1207_v13  ;;  %v523_v60 = vmul.f32 %v1353_v47, %v1336_v38 }
 0x11a   :  { %991 = vadd.xlane.f32.xlu0 %v990_v28  ;;  %v1210_v46 = vpack.c.bf16 %v524_v18, %v524_v18  ;;  %v909_v56 = vmul.f32 %v524_v18, %v2050_v34 }
 0x11b   :  { %v1338_v63 = vpop.eup %1337  ;;  %v908_v23 = vmul.f32 %v523_v60, %v2053_v53  ;;  %v1209_v3 = vpack.c.bf16 %v523_v60, %v523_v60  ;;  %v1355_v53 = vld [vmem:[%s2472_s1 + $0xf0] sm:$0xff] }
 0x11c   :  { %v1340_v4 = vpop.eup %1339  ;;  %877 = vst.msk [vmem:[%s2474_s3 + $0x74] sm:$0xf] %vm687_vm1, %v1210_v46  ;;  %v999_v61 = vsel %vm110_vm0, %v909_v56, 0.0  ;;  %v526_v62 = vmul.f32 %v1354_v19, %v1338_v63 }
 0x11d   :  { %1000 = vadd.xlane.f32.xlu1 %v999_v61  ;;  %v996_v34 = vsel %vm110_vm0, %v908_v23, 0.0  ;;  %876 = vst.msk [vmem:[%s2474_s3 + $0x70] sm:$0xf] %vm687_vm1, %v1209_v3  ;;  %v525_v6 = vmul.f32 %v1355_v53, %v1340_v4 }
 0x11e   :  { %997 = vadd.xlane.f32.xlu0 %v996_v34  ;;  %v1212_v30 = vpack.c.bf16 %v526_v62, %v526_v62  ;;  %v911_v54 = vmul.f32 %v526_v62, %v2066_v40 }
 0x11f   :  { %v910_v31 = vmul.f32 %v525_v6, %v2481_v2  ;;  %v1211_v57 = vpack.c.bf16 %v525_v6, %v525_v6 }
 0x120   :  { %879 = vst.msk [vmem:[%s2474_s3 + $0x7c] sm:$0xf] %vm687_vm1, %v1212_v30  ;;  %v1005_v14 = vsel %vm110_vm0, %v911_v54, 0.0 }
 0x121   :  { %1006 = vadd.xlane.f32.xlu1 %v1005_v14  ;;  %v1002_v59 = vsel %vm110_vm0, %v910_v31, 0.0  ;;  %878 = vst.msk [vmem:[%s2474_s3 + $0x78] sm:$0xf] %vm687_vm1, %v1211_v57 }
 0x122   :  { %1003 = vadd.xlane.f32.xlu0 %v1002_v59 }
 0x172   :  { %v917_v40 = vpop.xlane.xlu1 %916 }
 0x173   :  { %v1009_v37 = vmul.f32 2.0, %v917_v40  ;;  %v914_v8 = vpop.xlane.xlu0 %913 }
 0x174   :  { %v1008_v29 = vmul.f32 2.0, %v914_v8 }
 0x175   :  { %1042 = vst.msk [vmem:[%s2475_s4 + $0x8] sm:$0xff] %vm1040_vm2, %v1009_v37 }
 0x176   :  { %1041 = vst.msk [vmem:[%s2475_s4] sm:$0xff] %vm1040_vm2, %v1008_v29  ;;  %v923_v36 = vpop.xlane.xlu1 %922 }
 0x177   :  { %v1011_v32 = vmul.f32 2.0, %v923_v36  ;;  %v920_v15 = vpop.xlane.xlu0 %919 }
 0x178   :  { %v1010_v51 = vmul.f32 2.0, %v920_v15 }
 0x179   :  { %1044 = vst.msk [vmem:[%s2475_s4 + $0x18] sm:$0xff] %vm1040_vm2, %v1011_v32 }
 0x17a   :  { %1043 = vst.msk [vmem:[%s2475_s4 + $0x10] sm:$0xff] %vm1040_vm2, %v1010_v51  ;;  %v929_v20 = vpop.xlane.xlu1 %928 }
 0x17b   :  { %v1013_v43 = vmul.f32 2.0, %v929_v20  ;;  %v926_v9 = vpop.xlane.xlu0 %925 }
 0x17c   :  { %v1012_v58 = vmul.f32 2.0, %v926_v9 }
 0x17d   :  { %1046 = vst.msk [vmem:[%s2475_s4 + $0x28] sm:$0xff] %vm1040_vm2, %v1013_v43 }
 0x17e   :  { %1045 = vst.msk [vmem:[%s2475_s4 + $0x20] sm:$0xff] %vm1040_vm2, %v1012_v58  ;;  %v935_v21 = vpop.xlane.xlu1 %934 }
 0x17f   :  { %v1015_v33 = vmul.f32 2.0, %v935_v21  ;;  %v932_v48 = vpop.xlane.xlu0 %931 }
 0x180   :  { %v1014_v42 = vmul.f32 2.0, %v932_v48 }
 0x181   :  { %1048 = vst.msk [vmem:[%s2475_s4 + $0x38] sm:$0xff] %vm1040_vm2, %v1015_v33 }
 0x182   :  { %1047 = vst.msk [vmem:[%s2475_s4 + $0x30] sm:$0xff] %vm1040_vm2, %v1014_v42  ;;  %v941_v50 = vpop.xlane.xlu1 %940 }
 0x183   :  { %v1017_v5 = vmul.f32 2.0, %v941_v50  ;;  %v938_v16 = vpop.xlane.xlu0 %937 }
 0x184   :  { %v1016_v35 = vmul.f32 2.0, %v938_v16 }
 0x185   :  { %1050 = vst.msk [vmem:[%s2475_s4 + $0x48] sm:$0xff] %vm1040_vm2, %v1017_v5 }
 0x186   :  { %1049 = vst.msk [vmem:[%s2475_s4 + $0x40] sm:$0xff] %vm1040_vm2, %v1016_v35  ;;  %v947_v10 = vpop.xlane.xlu1 %946 }
 0x187   :  { %v1019_v49 = vmul.f32 2.0, %v947_v10  ;;  %v944_v1 = vpop.xlane.xlu0 %943 }
 0x188   :  { %v1018_v52 = vmul.f32 2.0, %v944_v1 }
 0x189   :  { %1052 = vst.msk [vmem:[%s2475_s4 + $0x58] sm:$0xff] %vm1040_vm2, %v1019_v49 }
 0x18a   :  { %1051 = vst.msk [vmem:[%s2475_s4 + $0x50] sm:$0xff] %vm1040_vm2, %v1018_v52  ;;  %v953_v44 = vpop.xlane.xlu1 %952 }
 0x18b   :  { %v1021_v7 = vmul.f32 2.0, %v953_v44  ;;  %v950_v55 = vpop.xlane.xlu0 %949 }
 0x18c   :  { %v1020_v26 = vmul.f32 2.0, %v950_v55 }
 0x18d   :  { %1054 = vst.msk [vmem:[%s2475_s4 + $0x68] sm:$0xff] %vm1040_vm2, %v1021_v7 }
 0x18e   :  { %1053 = vst.msk [vmem:[%s2475_s4 + $0x60] sm:$0xff] %vm1040_vm2, %v1020_v26  ;;  %v959_v17 = vpop.xlane.xlu1 %958 }
 0x18f   :  { %v1023_v11 = vmul.f32 2.0, %v959_v17  ;;  %v956_v22 = vpop.xlane.xlu0 %955 }
 0x190   :  { %v1022_v41 = vmul.f32 2.0, %v956_v22 }
 0x191   :  { %1056 = vst.msk [vmem:[%s2475_s4 + $0x78] sm:$0xff] %vm1040_vm2, %v1023_v11 }
 0x192   :  { %1055 = vst.msk [vmem:[%s2475_s4 + $0x70] sm:$0xff] %vm1040_vm2, %v1022_v41  ;;  %v965_v25 = vpop.xlane.xlu1 %964 }
 0x193   :  { %v1025_v45 = vmul.f32 2.0, %v965_v25  ;;  %v962_v12 = vpop.xlane.xlu0 %961 }
 0x194   :  { %v1024_v24 = vmul.f32 2.0, %v962_v12 }
 0x195   :  { %1058 = vst.msk [vmem:[%s2475_s4 + $0x88] sm:$0xff] %vm1040_vm2, %v1025_v45 }
 0x196   :  { %1057 = vst.msk [vmem:[%s2475_s4 + $0x80] sm:$0xff] %vm1040_vm2, %v1024_v24  ;;  %v971_v27 = vpop.xlane.xlu1 %970 }
 0x197   :  { %v1027_v13 = vmul.f32 2.0, %v971_v27  ;;  %v968_v38 = vpop.xlane.xlu0 %967 }
 0x198   :  { %v1026_v39 = vmul.f32 2.0, %v968_v38 }
 0x199   :  { %1060 = vst.msk [vmem:[%s2475_s4 + $0x98] sm:$0xff] %vm1040_vm2, %v1027_v13 }
 0x19a   :  { %1059 = vst.msk [vmem:[%s2475_s4 + $0x90] sm:$0xff] %vm1040_vm2, %v1026_v39  ;;  %v977_v0 = vpop.xlane.xlu1 %976 }
 0x19b   :  { %v1029_v18 = vmul.f32 2.0, %v977_v0  ;;  %v974_v28 = vpop.xlane.xlu0 %973 }
 0x19c   :  { %v1028_v47 = vmul.f32 2.0, %v974_v28 }
 0x19d   :  { %1062 = vst.msk [vmem:[%s2475_s4 + $0xa8] sm:$0xff] %vm1040_vm2, %v1029_v18 }
 0x19e   :  { %1061 = vst.msk [vmem:[%s2475_s4 + $0xa0] sm:$0xff] %vm1040_vm2, %v1028_v47  ;;  %v983_v60 = vpop.xlane.xlu1 %982 }
 0x19f   :  { %v1031_v46 = vmul.f32 2.0, %v983_v60  ;;  %v980_v56 = vpop.xlane.xlu0 %979 }
 0x1a0   :  { %v1030_v63 = vmul.f32 2.0, %v980_v56 }
 0x1a1   :  { %1064 = vst.msk [vmem:[%s2475_s4 + $0xb8] sm:$0xff] %vm1040_vm2, %v1031_v46 }
 0x1a2   :  { %1063 = vst.msk [vmem:[%s2475_s4 + $0xb0] sm:$0xff] %vm1040_vm2, %v1030_v63  ;;  %v989_v23 = vpop.xlane.xlu1 %988 }
 0x1a3   :  { %v1033_v3 = vmul.f32 2.0, %v989_v23  ;;  %v986_v4 = vpop.xlane.xlu0 %985 }
 0x1a4   :  { %v1032_v61 = vmul.f32 2.0, %v986_v4 }
 0x1a5   :  { %1066 = vst.msk [vmem:[%s2475_s4 + $0xc8] sm:$0xff] %vm1040_vm2, %v1033_v3 }
 0x1a6   :  { %1065 = vst.msk [vmem:[%s2475_s4 + $0xc0] sm:$0xff] %vm1040_vm2, %v1032_v61  ;;  %v995_v19 = vpop.xlane.xlu1 %994 }
 0x1a7   :  { %v1035_v62 = vmul.f32 2.0, %v995_v19  ;;  %v992_v34 = vpop.xlane.xlu0 %991 }
 0x1a8   :  { %v1034_v53 = vmul.f32 2.0, %v992_v34 }
 0x1a9   :  { %1068 = vst.msk [vmem:[%s2475_s4 + $0xd8] sm:$0xff] %vm1040_vm2, %v1035_v62 }
 0x1aa   :  { %1067 = vst.msk [vmem:[%s2475_s4 + $0xd0] sm:$0xff] %vm1040_vm2, %v1034_v53  ;;  %v1001_v6 = vpop.xlane.xlu1 %1000 }
 0x1ab   :  { %v1037_v30 = vmul.f32 2.0, %v1001_v6  ;;  %v998_v54 = vpop.xlane.xlu0 %997 }
 0x1ac   :  { %v1036_v2 = vmul.f32 2.0, %v998_v54 }
 0x1ad   :  { %1070 = vst.msk [vmem:[%s2475_s4 + $0xe8] sm:$0xff] %vm1040_vm2, %v1037_v30 }
 0x1ae   :  { %1069 = vst.msk [vmem:[%s2475_s4 + $0xe0] sm:$0xff] %vm1040_vm2, %v1036_v2  ;;  %v1007_v31 = vpop.xlane.xlu1 %1006 }
 0x1af   :  { %v1039_v57 = vmul.f32 2.0, %v1007_v31  ;;  %v1004_v14 = vpop.xlane.xlu0 %1003 }
 0x1b0   :  { %v1038_v59 = vmul.f32 2.0, %v1004_v14 }
 0x1b1   :  { %1072 = vst.msk [vmem:[%s2475_s4 + $0xf8] sm:$0xff] %vm1040_vm2, %v1039_v57 }
 0x1b2   :  { %1071 = vst.msk [vmem:[%s2475_s4 + $0xf0] sm:$0xff] %vm1040_vm2, %v1038_v59 }

</bundles_post_ra>
